<compile_context>
chip_gen: v5e
topology: v5e:2x2
jax: 0.10.0
libtpu: 0.0.40
codegen_flags: <defaults>
</compile_context>

<pallas_src>
import functools

import jax
import jax.numpy as jnp
import numpy as np
from jax import lax
from jax.experimental import pallas as pl
from jax.experimental.pallas import tpu as pltpu

SELU_ALPHA = 1.6732632423543772848170429916717
SELU_SCALE = 1.0507009873554804934193349852946
BN_EPS = 1e-5


def _selu(x):
    return SELU_SCALE * jnp.where(x > 0, x, SELU_ALPHA * (jnp.exp(x) - 1.0))


# ----------------------------------------------------------------------------
# Fused residual-block kernel: conv_in -> [ResUnit]*R -> SELU -> conv_out
# One grid step == G images; activations are (inter, G*Lstride) lane-flat values.
# ----------------------------------------------------------------------------
def _resnn_block_kernel(x_ref, w_ref, p_ref, m_ref, o_ref, *, shifts,
                        num_resunits):
    # x_ref : (1, inter, GLp)        zero-halo, zero-channel-padded flat input
    # w_ref : (2+2R, inter, 9*inter) stacked transposed/zero-padded conv weights
    # p_ref : (inter, 2+6R)          packed per-channel vectors (BN scale/shift, biases)
    # m_ref : (1, GLp)               interior mask (1 inside the image, 0 at halo/pad)
    # o_ref : (1, inter, GLp)        lane-dense output (first cout rows are valid)
    mask = m_ref[...]                                     # (1, GLp)

    def pcol(j):
        # One packed per-channel parameter as an (inter, 1) column (lane-broadcasts).
        return p_ref[:, j:j + 1]

    def conv3x3(h, widx, bias_col):
        # h: (inter, GLp) with zero halo.  Build the im2col patch with lane rolls
        # (XLU) and do ONE transposed GEMM on the MXU with spatial in the lane dim:
        #   (inter, 9*inter) @ (9*inter, GLp) -> (inter, GLp)
        # NOTE: operands kept f32 (not MXU-bound at inter=8 and keeps the validation
        # tolerance tight); cast patch/weights to bf16 here if inter_channels grows
        # (bf16 is the native MXU dtype on v5e/v6e/v7x).
        pieces = [h if s == 0 else pltpu.roll(h, shift=s, axis=1) for s in shifts]
        patch = jnp.concatenate(pieces, axis=0)           # (9*inter, GLp)
        return jnp.dot(w_ref[widx], patch,
                       preferred_element_type=jnp.float32) + bias_col

    # Conv2d(in, inter, 3, 1, 1): raw input was zero-padded in the wrapper, so its
    # halo is already exactly zero (padding precedes any elementwise op).
    h = conv3x3(x_ref[0], 0, pcol(0))                     # (inter, GLp)

    # ResUnit: out = conv2(selu(bn2(conv1(selu(bn1(x)))))) + x
    # The mask multiply re-zeroes the halo right before each conv, which is exactly
    # where PyTorch's zero padding is applied (after BN+SELU).
    for r in range(num_resunits):
        c = 1 + 6 * r
        a1 = _selu(h * pcol(c) + pcol(c + 1)) * mask
        h1 = conv3x3(a1, 1 + 2 * r, pcol(c + 2))
        a2 = _selu(h1 * pcol(c + 3) + pcol(c + 4)) * mask
        h = conv3x3(a2, 2 + 2 * r, pcol(c + 5)) + h       # residual add

    # SELU -> Conv2d(inter, out, 3, 1, 1)
    a = _selu(h) * mask
    out = conv3x3(a, 1 + 2 * num_resunits, pcol(1 + 6 * num_resunits))
    o_ref[0] = out


# ----------------------------------------------------------------------------
# Wrapper: layout glue + parameter packing + single pallas_call
# ----------------------------------------------------------------------------
def _fold_bn(bn):
    # Eval-mode BN folded to per-channel scale/shift: x*scale + shift.
    gamma, beta, mean, var = bn
    scale = gamma * lax.rsqrt(var + BN_EPS)
    shift = beta - mean * scale
    return scale, shift


def resnn_forward(x_nchw, block_params, inlist):
    """ResNN forward, splitmode='split' (equal splits, shared block weights)."""
    B, C, H, W = x_nchw.shape
    seq = len(inlist)
    cin = inlist[0]
    assert all(c == cin for c in inlist) and seq * cin == C
    w_in, b_in = block_params["conv_in"]
    w_out, b_out = block_params["conv_out"]
    inter = w_in.shape[-1]
    cout = w_out.shape[-1]
    R = len(block_params["resunits"])
    # TODO(synk): generalize the padding target to max(cin, cout, inter) for the
    # 'concat'/'cpt' split modes where cout may exceed inter_channels.
    assert inter >= cin and inter >= cout

    # Shared weights across splits -> fold splits into the batch dimension.
    N = B * seq
    n_steps = 2 if (N % 2 == 0 and N >= 2) else 1         # >=2 parallel steps feeds both v7x TCs
    G = N // n_steps                                       # images folded into each GEMM
    Hp, Wp = H + 2, W + 2
    Lp = Hp * Wp
    Lstride = ((Lp + 127) // 128) * 128                    # lane-aligned per-image stride
    GLp = G * Lstride

    # ---- input: NCHW -> per-split images -> zero-pad channels + 1px halo -> lane-flat
    xs = x_nchw.reshape(N, cin, H, W)
    xs = jnp.pad(xs, ((0, 0), (0, inter - cin), (1, 1), (1, 1)))     # (N, inter, Hp, Wp)
    xs = xs.reshape(N, inter, Lp)
    xs = jnp.pad(xs, ((0, 0), (0, 0), (0, Lstride - Lp)))
    xs = xs.reshape(n_steps, G, inter, Lstride).transpose(0, 2, 1, 3)
    xs = xs.reshape(n_steps, inter, GLp)                              # lane = g*Lstride + y*Wp + x

    # ---- packed parameters ---------------------------------------------------
    def fold_wT(w):
        # (3, 3, ci, co) -> zero-pad both channel dims to inter -> (inter, 9*inter)
        # with column ordering (dy*3+dx)*inter + ci, matching the patch row order.
        ci, co = w.shape[2], w.shape[3]
        w = jnp.pad(w, ((0, 0), (0, 0), (0, inter - ci), (0, inter - co)))
        return w.reshape(9 * inter, inter).T

    wts = [fold_wT(w_in)]
    vecs = [b_in]
    for ru in block_params["resunits"]:
        s1, t1 = _fold_bn(ru["bn1"])
        s2, t2 = _fold_bn(ru["bn2"])
        w1, b1 = ru["conv1"]
        w2, b2 = ru["conv2"]
        wts += [fold_wT(w1), fold_wT(w2)]
        vecs += [s1, t1, b1, s2, t2, b2]
    wts.append(fold_wT(w_out))
    vecs.append(jnp.pad(b_out, (0, inter - cout)))
    w_all = jnp.stack(wts, axis=0)                         # (2+2R, inter, 9*inter)
    pvec = jnp.stack(vecs, axis=1)                         # (inter, 2+6R)

    # ---- interior mask (1 inside the image, 0 at halo rows/cols and lane padding)
    m2d = np.zeros((Hp, Wp), np.float32)
    m2d[1:H + 1, 1:W + 1] = 1.0
    mrow = np.zeros((Lstride,), np.float32)
    mrow[:Lp] = m2d.reshape(-1)
    mask = jnp.asarray(np.tile(mrow, G)).reshape(1, GLp)

    # Lane shifts for the 9 conv taps: shifted[:, p] = h[:, p + (dy-1)*Wp + (dx-1)].
    shifts = tuple(int((-((dy - 1) * Wp + (dx - 1))) % GLp)
                   for dy in range(3) for dx in range(3))

    kernel = functools.partial(_resnn_block_kernel, shifts=shifts,
                               num_resunits=R)
    n_w = w_all.shape[0]
    n_v = pvec.shape[1]

    out = pl.pallas_call(
        kernel,
        out_shape=jax.ShapeDtypeStruct((n_steps, inter, GLp), jnp.float32),
        grid=(n_steps,),
        in_specs=[
            pl.BlockSpec((1, inter, GLp), lambda i: (i, 0, 0)),
            pl.BlockSpec((n_w, inter, 9 * inter), lambda i: (0, 0, 0)),
            pl.BlockSpec((inter, n_v), lambda i: (0, 0)),
            pl.BlockSpec((1, GLp), lambda i: (0, 0)),
        ],
        out_specs=pl.BlockSpec((1, inter, GLp), lambda i: (i, 0, 0)),
        compiler_params=pltpu.CompilerParams(
            dimension_semantics=("parallel",)),
    )(xs, w_all, pvec, mask)

    # ---- lane-flat padded output -> interior crop -> NCHW -> re-concat splits
    out = out.reshape(n_steps, inter, G, Lstride)[:, :cout, :, :Lp]
    out = out.reshape(n_steps, cout, G, Hp, Wp).transpose(0, 2, 1, 3, 4)
    out = out.reshape(N, cout, Hp, Wp)[:, :, 1:H + 1, 1:W + 1]
    return out.reshape(B, seq, cout, H, W).reshape(B, seq * cout, H, W)


# ----------------------------------------------------------------------------
# Parameter init (deterministic, synthetic)
# ----------------------------------------------------------------------------
def _conv_params(key, cin, cout, scale=0.1):
    kw, kb = jax.random.split(key)
    w = scale * jax.random.normal(kw, (3, 3, cin, cout), jnp.float32)
    b = scale * jax.random.normal(kb, (cout,), jnp.float32)
    return w, b


def _bn_params(key, c):
    k1, k2, k3, k4 = jax.random.split(key, 4)
    gamma = 1.0 + 0.1 * jax.random.normal(k1, (c,), jnp.float32)
    beta = 0.1 * jax.random.normal(k2, (c,), jnp.float32)
    mean = 0.1 * jax.random.normal(k3, (c,), jnp.float32)
    var = 0.5 + jax.random.uniform(k4, (c,), jnp.float32)
    return gamma, beta, mean, var


def init_resblock_params(key, in_ch, out_ch, inter_ch, repetation):
    keys = jax.random.split(key, 2 + repetation)
    params = {
        "conv_in": _conv_params(keys[0], in_ch, inter_ch),
        "conv_out": _conv_params(keys[1], inter_ch, out_ch),
        "resunits": [],
    }
    for r in range(repetation):
        k1, k2, k3, k4 = jax.random.split(keys[2 + r], 4)
        params["resunits"].append({
            "bn1": _bn_params(k1, inter_ch),
            "conv1": _conv_params(k2, inter_ch, inter_ch),
            "bn2": _bn_params(k3, inter_ch),
            "conv2": _conv_params(k4, inter_ch, inter_ch),
        })
    return params


# ----------------------------------------------------------------------------
# Pure-JAX reference for validation (mirrors the PyTorch forward per split)
# ----------------------------------------------------------------------------
def _conv_ref(x, w, b):
    return lax.conv_general_dilated(
        x, w, window_strides=(1, 1), padding="SAME",
        dimension_numbers=("NHWC", "HWIO", "NHWC"),
        precision=lax.Precision.HIGHEST) + b


def _bn_ref(x, g, bta, m, v):
    return (x - m) * lax.rsqrt(v + BN_EPS) * g + bta


def resnn_forward_ref(x_nchw, bp, inlist):
    outs = []
    start = 0
    for c in inlist:
        xs = x_nchw[:, start:start + c]
        start += c
        h = jnp.transpose(xs, (0, 2, 3, 1))
        h = _conv_ref(h, *bp["conv_in"])
        for ru in bp["resunits"]:
            res = h
            h1 = _conv_ref(_selu(_bn_ref(h, *ru["bn1"])), *ru["conv1"])
            h = _conv_ref(_selu(_bn_ref(h1, *ru["bn2"])), *ru["conv2"]) + res
        h = _conv_ref(_selu(h), *bp["conv_out"])
        outs.append(jnp.transpose(h, (0, 3, 1, 2)))
    return jnp.concatenate(outs, axis=1)


if __name__ == "__main__":
    # ResNN(in_channels=4, out_channels=4, inter_channels=8, repetation=1,
    #       bnmode=True, splitmode='split', cpt=[1, 1])
    in_channels, out_channels, inter_channels = 4, 4, 8
    repetation = 1
    cpt = [1, 1]
    seq_num = sum(cpt)
    inscale = in_channels // seq_num
    outscale = out_channels // seq_num
    inlist = [inscale] * seq_num                           # [2, 2]

    key = jax.random.PRNGKey(0)
    kx, kp = jax.random.split(key)
    x = jax.random.normal(kx, (2, in_channels, 16, 16), jnp.float32)

    # splitmode='split': ONE shared block, applied to every split.
    block_params = init_resblock_params(kp, inscale, outscale,
                                        inter_channels, repetation)

    fwd = jax.jit(lambda xx, pp: resnn_forward(xx, pp, inlist))
    out = jax.block_until_ready(fwd(x, block_params))
    assert out.shape == (2, out_channels, 16, 16), out.shape

    ref = resnn_forward_ref(x, block_params, inlist)
    max_err = float(jnp.max(jnp.abs(out - ref)))
    if not np.allclose(np.asarray(out), np.asarray(ref), atol=3e-3, rtol=3e-3):
        raise AssertionError(
            f"Pallas ResNN output mismatch vs JAX reference (max |err|={max_err:.2e})")

    print("KERNEL_OK")
</pallas_src>

<mosaic_0001>
module attributes {stable_mosaic.version = 11 : i64} {
  func.func @_resnn_block_kernel(%arg0: i32, %arg1: memref<1x8x768xf32, #tpu.memory_space<vmem>>, %arg2: memref<4x8x72xf32, #tpu.memory_space<vmem>>, %arg3: memref<8x8xf32, #tpu.memory_space<vmem>>, %arg4: memref<1x768xf32, #tpu.memory_space<vmem>>, %arg5: memref<1x8x768xf32, #tpu.memory_space<vmem>>) attributes {dimension_semantics = [#tpu.dimension_semantics<parallel>], iteration_bounds = array<i64: 2>, scalar_prefetch = 0 : i64, scratch_operands = 0 : i64, tpu.core_type = #tpu.core_type<tc>, window_params = [{transform_indices = @transform_0, window_bounds = array<i64: 1, 8, 768>}, {pipeline_mode = #tpu.pipeline_mode<synchronous>, transform_indices = @transform_1, window_bounds = array<i64: 4, 8, 72>}, {pipeline_mode = #tpu.pipeline_mode<synchronous>, transform_indices = @transform_2, window_bounds = array<i64: 8, 8>}, {pipeline_mode = #tpu.pipeline_mode<synchronous>, transform_indices = @transform_3, window_bounds = array<i64: 1, 768>}, {transform_indices = @transform_4, window_bounds = array<i64: 1, 8, 768>}]} {
    %c0 = arith.constant 0 : index
    %c0_0 = arith.constant 0 : index
    %0 = vector.load %arg4[%c0, %c0_0] : memref<1x768xf32, #tpu.memory_space<vmem>>, vector<1x768xf32>
    %c0_1 = arith.constant 0 : index
    %c0_2 = arith.constant 0 : index
    %c0_3 = arith.constant 0 : index
    %1 = vector.load %arg1[%c0_1, %c0_2, %c0_3] : memref<1x8x768xf32, #tpu.memory_space<vmem>>, vector<1x8x768xf32>
    %2 = vector.shape_cast %1 : vector<1x8x768xf32> to vector<8x768xf32>
    %c0_4 = arith.constant 0 : index
    %c0_5 = arith.constant 0 : index
    %3 = vector.load %arg3[%c0_4, %c0_5] : memref<8x8xf32, #tpu.memory_space<vmem>>, vector<8x1xf32>
    %c19_i32 = arith.constant 19 : i32
    %4 = tpu.dynamic_rotate %2 by %c19_i32 dim 1 : vector<8x768xf32>, i32 -> vector<8x768xf32>
    %c18_i32 = arith.constant 18 : i32
    %5 = tpu.dynamic_rotate %2 by %c18_i32 dim 1 : vector<8x768xf32>, i32 -> vector<8x768xf32>
    %c17_i32 = arith.constant 17 : i32
    %6 = tpu.dynamic_rotate %2 by %c17_i32 dim 1 : vector<8x768xf32>, i32 -> vector<8x768xf32>
    %c1_i32 = arith.constant 1 : i32
    %7 = tpu.dynamic_rotate %2 by %c1_i32 dim 1 : vector<8x768xf32>, i32 -> vector<8x768xf32>
    %c767_i32 = arith.constant 767 : i32
    %8 = tpu.dynamic_rotate %2 by %c767_i32 dim 1 : vector<8x768xf32>, i32 -> vector<8x768xf32>
    %c751_i32 = arith.constant 751 : i32
    %9 = tpu.dynamic_rotate %2 by %c751_i32 dim 1 : vector<8x768xf32>, i32 -> vector<8x768xf32>
    %c750_i32 = arith.constant 750 : i32
    %10 = tpu.dynamic_rotate %2 by %c750_i32 dim 1 : vector<8x768xf32>, i32 -> vector<8x768xf32>
    %c749_i32 = arith.constant 749 : i32
    %11 = tpu.dynamic_rotate %2 by %c749_i32 dim 1 : vector<8x768xf32>, i32 -> vector<8x768xf32>
    %12 = tpu.concatenate %4, %5, %6, %7, %2, %8, %9, %10, %11 in 0 : vector<8x768xf32>, vector<8x768xf32>, vector<8x768xf32>, vector<8x768xf32>, vector<8x768xf32>, vector<8x768xf32>, vector<8x768xf32>, vector<8x768xf32>, vector<8x768xf32> -> vector<72x768xf32>
    %c0_6 = arith.constant 0 : index
    %c0_7 = arith.constant 0 : index
    %c0_8 = arith.constant 0 : index
    %13 = vector.load %arg2[%c0_6, %c0_7, %c0_8] : memref<4x8x72xf32, #tpu.memory_space<vmem>>, vector<1x8x72xf32>
    %14 = vector.shape_cast %13 : vector<1x8x72xf32> to vector<8x72xf32>
    %cst = arith.constant dense<0.000000e+00> : vector<8x768xf32>
    %15 = tpu.matmul %14, %12, %cst {dimension_numbers = #tpu.dot_dimension_numbers<[1], [0], [0], [1], [0, 0, 1, 1], [], []>} : vector<8x72xf32>, vector<72x768xf32>, vector<8x768xf32> -> vector<8x768xf32>
    %16 = vector.broadcast %3 : vector<8x1xf32> to vector<8x768xf32>
    %17 = arith.addf %15, %16 : vector<8x768xf32>
    %c0_9 = arith.constant 0 : index
    %c1 = arith.constant 1 : index
    %18 = vector.load %arg3[%c0_9, %c1] : memref<8x8xf32, #tpu.memory_space<vmem>>, vector<8x1xf32>
    %19 = vector.broadcast %18 : vector<8x1xf32> to vector<8x768xf32>
    %20 = arith.mulf %17, %19 : vector<8x768xf32>
    %c0_10 = arith.constant 0 : index
    %c2 = arith.constant 2 : index
    %21 = vector.load %arg3[%c0_10, %c2] : memref<8x8xf32, #tpu.memory_space<vmem>>, vector<8x1xf32>
    %22 = vector.broadcast %21 : vector<8x1xf32> to vector<8x768xf32>
    %23 = arith.addf %20, %22 : vector<8x768xf32>
    %cst_11 = arith.constant 0.000000e+00 : f32
    %24 = vector.broadcast %cst_11 : f32 to vector<8x768xf32>
    %25 = arith.cmpf ogt, %23, %24 : vector<8x768xf32>
    %26 = math.exp %23 : vector<8x768xf32>
    %cst_12 = arith.constant 1.000000e+00 : f32
    %27 = vector.broadcast %cst_12 : f32 to vector<8x768xf32>
    %28 = arith.subf %26, %27 : vector<8x768xf32>
    %cst_13 = arith.constant 1.67326319 : f32
    %29 = vector.broadcast %cst_13 : f32 to vector<8x768xf32>
    %30 = arith.mulf %29, %28 : vector<8x768xf32>
    %31 = arith.select %25, %23, %30 : vector<8x768xi1>, vector<8x768xf32>
    %cst_14 = arith.constant 1.05070102 : f32
    %32 = vector.broadcast %cst_14 : f32 to vector<8x768xf32>
    %33 = arith.mulf %32, %31 : vector<8x768xf32>
    %34 = vector.broadcast %0 : vector<1x768xf32> to vector<8x768xf32>
    %35 = arith.mulf %33, %34 : vector<8x768xf32>
    %c0_15 = arith.constant 0 : index
    %c3 = arith.constant 3 : index
    %36 = vector.load %arg3[%c0_15, %c3] : memref<8x8xf32, #tpu.memory_space<vmem>>, vector<8x1xf32>
    %c19_i32_16 = arith.constant 19 : i32
    %37 = tpu.dynamic_rotate %35 by %c19_i32_16 dim 1 : vector<8x768xf32>, i32 -> vector<8x768xf32>
    %c18_i32_17 = arith.constant 18 : i32
    %38 = tpu.dynamic_rotate %35 by %c18_i32_17 dim 1 : vector<8x768xf32>, i32 -> vector<8x768xf32>
    %c17_i32_18 = arith.constant 17 : i32
    %39 = tpu.dynamic_rotate %35 by %c17_i32_18 dim 1 : vector<8x768xf32>, i32 -> vector<8x768xf32>
    %c1_i32_19 = arith.constant 1 : i32
    %40 = tpu.dynamic_rotate %35 by %c1_i32_19 dim 1 : vector<8x768xf32>, i32 -> vector<8x768xf32>
    %c767_i32_20 = arith.constant 767 : i32
    %41 = tpu.dynamic_rotate %35 by %c767_i32_20 dim 1 : vector<8x768xf32>, i32 -> vector<8x768xf32>
    %c751_i32_21 = arith.constant 751 : i32
    %42 = tpu.dynamic_rotate %35 by %c751_i32_21 dim 1 : vector<8x768xf32>, i32 -> vector<8x768xf32>
    %c750_i32_22 = arith.constant 750 : i32
    %43 = tpu.dynamic_rotate %35 by %c750_i32_22 dim 1 : vector<8x768xf32>, i32 -> vector<8x768xf32>
    %c749_i32_23 = arith.constant 749 : i32
    %44 = tpu.dynamic_rotate %35 by %c749_i32_23 dim 1 : vector<8x768xf32>, i32 -> vector<8x768xf32>
    %45 = tpu.concatenate %37, %38, %39, %40, %35, %41, %42, %43, %44 in 0 : vector<8x768xf32>, vector<8x768xf32>, vector<8x768xf32>, vector<8x768xf32>, vector<8x768xf32>, vector<8x768xf32>, vector<8x768xf32>, vector<8x768xf32>, vector<8x768xf32> -> vector<72x768xf32>
    %c1_24 = arith.constant 1 : index
    %c0_25 = arith.constant 0 : index
    %c0_26 = arith.constant 0 : index
    %46 = vector.load %arg2[%c1_24, %c0_25, %c0_26] : memref<4x8x72xf32, #tpu.memory_space<vmem>>, vector<1x8x72xf32>
    %47 = vector.shape_cast %46 : vector<1x8x72xf32> to vector<8x72xf32>
    %cst_27 = arith.constant dense<0.000000e+00> : vector<8x768xf32>
    %48 = tpu.matmul %47, %45, %cst_27 {dimension_numbers = #tpu.dot_dimension_numbers<[1], [0], [0], [1], [0, 0, 1, 1], [], []>} : vector<8x72xf32>, vector<72x768xf32>, vector<8x768xf32> -> vector<8x768xf32>
    %49 = vector.broadcast %36 : vector<8x1xf32> to vector<8x768xf32>
    %50 = arith.addf %48, %49 : vector<8x768xf32>
    %c0_28 = arith.constant 0 : index
    %c4 = arith.constant 4 : index
    %51 = vector.load %arg3[%c0_28, %c4] : memref<8x8xf32, #tpu.memory_space<vmem>>, vector<8x1xf32>
    %52 = vector.broadcast %51 : vector<8x1xf32> to vector<8x768xf32>
    %53 = arith.mulf %50, %52 : vector<8x768xf32>
    %c0_29 = arith.constant 0 : index
    %c5 = arith.constant 5 : index
    %54 = vector.load %arg3[%c0_29, %c5] : memref<8x8xf32, #tpu.memory_space<vmem>>, vector<8x1xf32>
    %55 = vector.broadcast %54 : vector<8x1xf32> to vector<8x768xf32>
    %56 = arith.addf %53, %55 : vector<8x768xf32>
    %cst_30 = arith.constant 0.000000e+00 : f32
    %57 = vector.broadcast %cst_30 : f32 to vector<8x768xf32>
    %58 = arith.cmpf ogt, %56, %57 : vector<8x768xf32>
    %59 = math.exp %56 : vector<8x768xf32>
    %cst_31 = arith.constant 1.000000e+00 : f32
    %60 = vector.broadcast %cst_31 : f32 to vector<8x768xf32>
    %61 = arith.subf %59, %60 : vector<8x768xf32>
    %cst_32 = arith.constant 1.67326319 : f32
    %62 = vector.broadcast %cst_32 : f32 to vector<8x768xf32>
    %63 = arith.mulf %62, %61 : vector<8x768xf32>
    %64 = arith.select %58, %56, %63 : vector<8x768xi1>, vector<8x768xf32>
    %cst_33 = arith.constant 1.05070102 : f32
    %65 = vector.broadcast %cst_33 : f32 to vector<8x768xf32>
    %66 = arith.mulf %65, %64 : vector<8x768xf32>
    %67 = vector.broadcast %0 : vector<1x768xf32> to vector<8x768xf32>
    %68 = arith.mulf %66, %67 : vector<8x768xf32>
    %c0_34 = arith.constant 0 : index
    %c6 = arith.constant 6 : index
    %69 = vector.load %arg3[%c0_34, %c6] : memref<8x8xf32, #tpu.memory_space<vmem>>, vector<8x1xf32>
    %c19_i32_35 = arith.constant 19 : i32
    %70 = tpu.dynamic_rotate %68 by %c19_i32_35 dim 1 : vector<8x768xf32>, i32 -> vector<8x768xf32>
    %c18_i32_36 = arith.constant 18 : i32
    %71 = tpu.dynamic_rotate %68 by %c18_i32_36 dim 1 : vector<8x768xf32>, i32 -> vector<8x768xf32>
    %c17_i32_37 = arith.constant 17 : i32
    %72 = tpu.dynamic_rotate %68 by %c17_i32_37 dim 1 : vector<8x768xf32>, i32 -> vector<8x768xf32>
    %c1_i32_38 = arith.constant 1 : i32
    %73 = tpu.dynamic_rotate %68 by %c1_i32_38 dim 1 : vector<8x768xf32>, i32 -> vector<8x768xf32>
    %c767_i32_39 = arith.constant 767 : i32
    %74 = tpu.dynamic_rotate %68 by %c767_i32_39 dim 1 : vector<8x768xf32>, i32 -> vector<8x768xf32>
    %c751_i32_40 = arith.constant 751 : i32
    %75 = tpu.dynamic_rotate %68 by %c751_i32_40 dim 1 : vector<8x768xf32>, i32 -> vector<8x768xf32>
    %c750_i32_41 = arith.constant 750 : i32
    %76 = tpu.dynamic_rotate %68 by %c750_i32_41 dim 1 : vector<8x768xf32>, i32 -> vector<8x768xf32>
    %c749_i32_42 = arith.constant 749 : i32
    %77 = tpu.dynamic_rotate %68 by %c749_i32_42 dim 1 : vector<8x768xf32>, i32 -> vector<8x768xf32>
    %78 = tpu.concatenate %70, %71, %72, %73, %68, %74, %75, %76, %77 in 0 : vector<8x768xf32>, vector<8x768xf32>, vector<8x768xf32>, vector<8x768xf32>, vector<8x768xf32>, vector<8x768xf32>, vector<8x768xf32>, vector<8x768xf32>, vector<8x768xf32> -> vector<72x768xf32>
    %c2_43 = arith.constant 2 : index
    %c0_44 = arith.constant 0 : index
    %c0_45 = arith.constant 0 : index
    %79 = vector.load %arg2[%c2_43, %c0_44, %c0_45] : memref<4x8x72xf32, #tpu.memory_space<vmem>>, vector<1x8x72xf32>
    %80 = vector.shape_cast %79 : vector<1x8x72xf32> to vector<8x72xf32>
    %cst_46 = arith.constant dense<0.000000e+00> : vector<8x768xf32>
    %81 = tpu.matmul %80, %78, %cst_46 {dimension_numbers = #tpu.dot_dimension_numbers<[1], [0], [0], [1], [0, 0, 1, 1], [], []>} : vector<8x72xf32>, vector<72x768xf32>, vector<8x768xf32> -> vector<8x768xf32>
    %82 = vector.broadcast %69 : vector<8x1xf32> to vector<8x768xf32>
    %83 = arith.addf %81, %82 : vector<8x768xf32>
    %84 = arith.addf %83, %17 : vector<8x768xf32>
    %cst_47 = arith.constant 0.000000e+00 : f32
    %85 = vector.broadcast %cst_47 : f32 to vector<8x768xf32>
    %86 = arith.cmpf ogt, %84, %85 : vector<8x768xf32>
    %87 = math.exp %84 : vector<8x768xf32>
    %cst_48 = arith.constant 1.000000e+00 : f32
    %88 = vector.broadcast %cst_48 : f32 to vector<8x768xf32>
    %89 = arith.subf %87, %88 : vector<8x768xf32>
    %cst_49 = arith.constant 1.67326319 : f32
    %90 = vector.broadcast %cst_49 : f32 to vector<8x768xf32>
    %91 = arith.mulf %90, %89 : vector<8x768xf32>
    %92 = arith.select %86, %84, %91 : vector<8x768xi1>, vector<8x768xf32>
    %cst_50 = arith.constant 1.05070102 : f32
    %93 = vector.broadcast %cst_50 : f32 to vector<8x768xf32>
    %94 = arith.mulf %93, %92 : vector<8x768xf32>
    %95 = vector.broadcast %0 : vector<1x768xf32> to vector<8x768xf32>
    %96 = arith.mulf %94, %95 : vector<8x768xf32>
    %c0_51 = arith.constant 0 : index
    %c7 = arith.constant 7 : index
    %97 = vector.load %arg3[%c0_51, %c7] : memref<8x8xf32, #tpu.memory_space<vmem>>, vector<8x1xf32>
    %c19_i32_52 = arith.constant 19 : i32
    %98 = tpu.dynamic_rotate %96 by %c19_i32_52 dim 1 : vector<8x768xf32>, i32 -> vector<8x768xf32>
    %c18_i32_53 = arith.constant 18 : i32
    %99 = tpu.dynamic_rotate %96 by %c18_i32_53 dim 1 : vector<8x768xf32>, i32 -> vector<8x768xf32>
    %c17_i32_54 = arith.constant 17 : i32
    %100 = tpu.dynamic_rotate %96 by %c17_i32_54 dim 1 : vector<8x768xf32>, i32 -> vector<8x768xf32>
    %c1_i32_55 = arith.constant 1 : i32
    %101 = tpu.dynamic_rotate %96 by %c1_i32_55 dim 1 : vector<8x768xf32>, i32 -> vector<8x768xf32>
    %c767_i32_56 = arith.constant 767 : i32
    %102 = tpu.dynamic_rotate %96 by %c767_i32_56 dim 1 : vector<8x768xf32>, i32 -> vector<8x768xf32>
    %c751_i32_57 = arith.constant 751 : i32
    %103 = tpu.dynamic_rotate %96 by %c751_i32_57 dim 1 : vector<8x768xf32>, i32 -> vector<8x768xf32>
    %c750_i32_58 = arith.constant 750 : i32
    %104 = tpu.dynamic_rotate %96 by %c750_i32_58 dim 1 : vector<8x768xf32>, i32 -> vector<8x768xf32>
    %c749_i32_59 = arith.constant 749 : i32
    %105 = tpu.dynamic_rotate %96 by %c749_i32_59 dim 1 : vector<8x768xf32>, i32 -> vector<8x768xf32>
    %106 = tpu.concatenate %98, %99, %100, %101, %96, %102, %103, %104, %105 in 0 : vector<8x768xf32>, vector<8x768xf32>, vector<8x768xf32>, vector<8x768xf32>, vector<8x768xf32>, vector<8x768xf32>, vector<8x768xf32>, vector<8x768xf32>, vector<8x768xf32> -> vector<72x768xf32>
    %c3_60 = arith.constant 3 : index
    %c0_61 = arith.constant 0 : index
    %c0_62 = arith.constant 0 : index
    %107 = vector.load %arg2[%c3_60, %c0_61, %c0_62] : memref<4x8x72xf32, #tpu.memory_space<vmem>>, vector<1x8x72xf32>
    %108 = vector.shape_cast %107 : vector<1x8x72xf32> to vector<8x72xf32>
    %cst_63 = arith.constant dense<0.000000e+00> : vector<8x768xf32>
    %109 = tpu.matmul %108, %106, %cst_63 {dimension_numbers = #tpu.dot_dimension_numbers<[1], [0], [0], [1], [0, 0, 1, 1], [], []>} : vector<8x72xf32>, vector<72x768xf32>, vector<8x768xf32> -> vector<8x768xf32>
    %110 = vector.broadcast %97 : vector<8x1xf32> to vector<8x768xf32>
    %111 = arith.addf %109, %110 : vector<8x768xf32>
    %c0_64 = arith.constant 0 : index
    %c0_65 = arith.constant 0 : index
    %c0_66 = arith.constant 0 : index
    %112 = vector.load %arg5[%c0_64, %c0_65, %c0_66] : memref<1x8x768xf32, #tpu.memory_space<vmem>>, vector<1x8x768xf32>
    %113 = vector.shape_cast %112 : vector<1x8x768xf32> to vector<8x768xf32>
    %114 = vector.shape_cast %111 : vector<8x768xf32> to vector<1x8x768xf32>
    tpu.vector_store %arg5[%c0_64, %c0_65, %c0_66], %114 {strides = array<i32>} : memref<1x8x768xf32, #tpu.memory_space<vmem>>, vector<1x8x768xf32>,
    return
  }
  func.func @transform_0(%arg0: i32) -> (i32, i32, i32) {
    %c0_i32 = arith.constant 0 : i32
    %c0_i32_0 = arith.constant 0 : i32
    %c0_i32_1 = arith.constant 0 : i32
    return %arg0, %c0_i32, %c0_i32_0 : i32, i32, i32
  }
  func.func @transform_1(%arg0: i32) -> (i32, i32, i32) {
    %c0_i32 = arith.constant 0 : i32
    %c0_i32_0 = arith.constant 0 : i32
    %c0_i32_1 = arith.constant 0 : i32
    %c0_i32_2 = arith.constant 0 : i32
    return %c0_i32, %c0_i32_0, %c0_i32_1 : i32, i32, i32
  }
  func.func @transform_2(%arg0: i32) -> (i32, i32) {
    %c0_i32 = arith.constant 0 : i32
    %c0_i32_0 = arith.constant 0 : i32
    %c0_i32_1 = arith.constant 0 : i32
    return %c0_i32, %c0_i32_0 : i32, i32
  }
  func.func @transform_3(%arg0: i32) -> (i32, i32) {
    %c0_i32 = arith.constant 0 : i32
    %c0_i32_0 = arith.constant 0 : i32
    %c0_i32_1 = arith.constant 0 : i32
    return %c0_i32, %c0_i32_0 : i32, i32
  }
  func.func @transform_4(%arg0: i32) -> (i32, i32, i32) {
    %c0_i32 = arith.constant 0 : i32
    %c0_i32_0 = arith.constant 0 : i32
    %c0_i32_1 = arith.constant 0 : i32
    return %arg0, %c0_i32, %c0_i32_0 : i32, i32, i32
  }
}

</mosaic_0001>

<bundles_post_ra>
// kernel: _lambda_.1
= control target key start
LH: loop header
LB: loop body
LE: loop exit
PB: predicated region body
PF: predicated region fallthrough
CT: control target
= control target key end

     0   :  { %s2166_s15 = smov 0   ;;  %s3509_s0 = inlined_call_operand.vmem [shape: f32[2,8,768], index: 0, kind: input, shape index: {}]   ;;  %s3510_s1 = inlined_call_operand.vmem [shape: f32[4,8,72], index: 1, kind: input, shape index: {}]   ;;  %s3511_s2 = inlined_call_operand.vmem [shape: f32[8,8], index: 2, kind: input, shape index: {}]   ;;  %s3512_s3 = inlined_call_operand.vmem [shape: f32[1,768], index: 3, kind: input, shape index: {}]   ;;  %s3513_s4 = inlined_call_operand.vmem [shape: f32[2,8,768], index: 4, kind: output, shape index: {}]  }
   0x1 LB: > { %s1573_s16 = sadd.s32 4294967295, %s2123_s15   ;;  %p1577_p0 = scmp.ge.s32.totalorder %s2123_s15, 1  ;;  %s2123_s15 = sphi %s2166_s15, %s14_s15  }
   0x2   : > { %p162_p1 = scmp.lt.s32.totalorder %s2123_s15, 3 }
   0x4   : > { %p163_p2 = pnand %p1577_p0, %p162_p1 }
   0x5   : > { %p188_p3 = scmp.lt.s32.totalorder (!%p163_p2), %s1573_s16, 1  ;;  %s2125_s21 = smov (!%p163_p2), 109  }
   0x6   : > { %166 = sbr.rel (%p163_p2) target bundleno = 1330 (0x532), region = 36  ;;  %s2126_s22 = smov (!%p163_p2), 111  }
   0x7   : > { %s2127_s23 = smov (!%p163_p2), 110   ;;  %s2128_s24 = smov (!%p163_p2), 127  }
   0x8   : > { %s2129_s25 = smov (!%p163_p2), 17   ;;  %s2130_s26 = smov (!%p163_p2), 1  }
   0x9   : > { %s2131_s27 = smov (!%p163_p2), 18   ;;  %s2132_s28 = smov (!%p163_p2), 19  }
   0xb   : > { %s3515_s16 = smov (!%p188_p3, %s1573_s16), 1  ;;  %v218_v13 = vlaneseq  ;;  %vm366_vm8 = vcmask 588800  }
   0xc   : > { %s1627_s17 = smul.u32 48, %s3515_s16 }
   0xd   : > { %v2244_v15 = vand.u32 127, %v218_v13 }
   0xe   : > { %s192_s20 = scalar_lea.vmem %s3509_s0, %s1627_s17 }
   0xf   : > { %v2182_v0 = vld [vmem:[%s192_s20 + $0x10] sm:$0xff]  ;;  %v2184_v1 = vld [vmem:[%s192_s20 + $0x18] sm:$0xff]  ;;  %v2186_v2 = vld [vmem:[%s192_s20] sm:$0xff]  ;;  %vm353_vm0 = vcmp.lt.s32.totalorder %v2244_v15, 109  ;;  %vm334_vm1 = vcmp.lt.s32.totalorder %v2244_v15, 110  ;;  %vm315_vm2 = vcmp.lt.s32.totalorder %v2244_v15, 111 }
  0x10   : > { %v1662_v3 = vpack.i.bf16 %v2184_v1, %v2182_v0  ;;  %v2190_v4 = vld [vmem:[%s192_s20 + $0x8] sm:$0xff]  ;;  %v2197_v6 = vld [vmem:[%s192_s20 + $0x20] sm:$0xff]  ;;  %vm296_vm3 = vcmp.lt.s32.totalorder %v2244_v15, 127  ;;  %vm277_vm4 = vcmp.lt.s32.totalorder %v2244_v15, 1  ;;  %vm258_vm5 = vcmp.lt.s32.totalorder %v2244_v15, 17 }
  0x11   : > { %v1652_v5 = vpack.i.bf16 %v2190_v4, %v2186_v2  ;;  %v2199_v7 = vld [vmem:[%s192_s20 + $0x28] sm:$0xff]  ;;  %v1722_v10 = vpack.i.bf16 %v2182_v0, %v2190_v4  ;;  %vm239_vm6 = vcmp.lt.s32.totalorder %v2244_v15, 18  ;;  %vm220_vm7 = vcmp.lt.s32.totalorder %v2244_v15, 19 }
  0x12   : > { %1663 = vrot.lane.b32.xlu1 %v1662_v3, %s2125_s21  ;;  %v1667_v8 = vpack.i.bf16 %v2199_v7, %v2197_v6  ;;  %v1717_v9 = vpack.i.bf16 %v2199_v7, %v2186_v2 }
  0x13   : > { %1653 = vrot.lane.b32.xlu0 %v1652_v5, %s2125_s21  ;;  %1673 = vrot.lane.b32.xlu2 %v1652_v5, %s2126_s22 }
  0x1a   : > { %1668 = vrot.lane.b32.xlu1 %v1667_v8, %s2125_s21 }
  0x1b   : > { %1658 = vrot.lane.b32.xlu0 %v1652_v5, %s2127_s23  ;;  %1678 = vrot.lane.b32.xlu2 %v1662_v3, %s2127_s23 }
  0x22   : > { %1688 = vrot.lane.b32.xlu1 %v1652_v5, %s2128_s24 }
  0x23   : > { %1683 = vrot.lane.b32.xlu0 %v1667_v8, %s2127_s23  ;;  %1693 = vrot.lane.b32.xlu2 %v1662_v3, %s2126_s22 }
  0x2a   : > { %1703 = vrot.lane.b32.xlu1 %v1662_v3, %s2128_s24 }
  0x2b   : > { %1698 = vrot.lane.b32.xlu0 %v1667_v8, %s2126_s22  ;;  %1708 = vrot.lane.b32.xlu2 %v1667_v8, %s2128_s24 }
  0x32   : > { %1718 = vrot.lane.b32.xlu1 %v1717_v9, %s2129_s25 }
  0x33   : > { %1713 = vrot.lane.b32.xlu0 %v1717_v9, %s2130_s26  ;;  %1723 = vrot.lane.b32.xlu2 %v1722_v10, %s2130_s26 }
  0x3a   : > { %1728 = vrot.lane.b32.xlu1 %v1717_v9, %s2131_s27 }
  0x3b   : > { %271 = vrot.lane.b32.xlu0 %v2184_v1, %s2130_s26  ;;  %1733 = vrot.lane.b32.xlu2 %v1722_v10, %s2129_s25 }
  0x42   : > { %1738 = vrot.lane.b32.xlu1 %v1717_v9, %s2132_s28 }
  0x43   : > { %252 = vrot.lane.b32.xlu0 %v2184_v1, %s2129_s25  ;;  %1743 = vrot.lane.b32.xlu2 %v1722_v10, %s2131_s27 }
  0x4a   : > { %1748 = vrot.lane.b32.xlu1 %v1722_v10, %s2132_s28 }
  0x4b   : > { %233 = vrot.lane.b32.xlu0 %v2184_v1, %s2131_s27  ;;  %212 = vrot.lane.b32.xlu2 %v2184_v1, %s2132_s28 }
  0x52   : > { %254 = vrot.lane.b32.xlu1 %v2197_v6, %s2129_s25 }
  0x53   : > { %273 = vrot.lane.b32.xlu0 %v2197_v6, %s2130_s26  ;;  %235 = vrot.lane.b32.xlu2 %v2197_v6, %s2131_s27 }
  0x5b   : > { %214 = vrot.lane.b32.xlu0 %v2197_v6, %s2132_s28 }
  0x6d   : > { %v2240_v11 = vpop.permute.xlu2 %1673 }
  0x6e   : > { %v1676_v36 = vunpack.i.h.bf16 %v2240_v11  ;;  %v1675_v37 = vunpack.i.l.bf16 %v2240_v11 }
  0x70   : > { %v320_v43 = vsel %vm315_vm2, %v1675_v37, %v1676_v36 }
  0x75   : > { %v1679_v12 = vpop.permute.xlu2 %1678 }
  0x76   : > { %v1681_v16 = vunpack.i.h.bf16 %v1679_v12  ;;  %v1680_v18 = vunpack.i.l.bf16 %v1679_v12 }
  0x78   : > { %v337_v28 = vsel %vm334_vm1, %v1680_v18, %v1681_v16 }
  0x7d   : > { %v2242_v14 = vpop.permute.xlu2 %1693 }
  0x7e   : > { %v1696_v19 = vunpack.i.h.bf16 %v2242_v14  ;;  %v1695_v26 = vunpack.i.l.bf16 %v2242_v14 }
  0x80   : > { %v318_v31 = vsel %vm315_vm2, %v1695_v26, %v1696_v19  ;;  %v319_v44 = vsel %vm315_vm2, %v1676_v36, %v1695_v26 }
  0x84   : > { %v1664_v17 = vpop.permute.xlu1 %1663 }
  0x85   : > { %v1666_v20 = vunpack.i.h.bf16 %v1664_v17  ;;  %v1665_v21 = vunpack.i.l.bf16 %v1664_v17  ;;  %v2248_v22 = vpop.permute.xlu0 %1653  ;;  %v2250_v23 = vpop.permute.xlu2 %1708 }
  0x86   : > { %v1656_v24 = vunpack.i.h.bf16 %v2248_v22  ;;  %v1655_v25 = vunpack.i.l.bf16 %v2248_v22  ;;  %v1710_v58 = vunpack.i.l.bf16 %v2250_v23 }
  0x87   : > { %v356_v27 = vsel %vm353_vm0, %v1665_v21, %v1666_v20 }
  0x88   : > { %v357_v29 = vsel %vm353_vm0, %v1656_v24, %v1665_v21  ;;  %417 = vmatpush.msra.mxu2 %v356_v27  ;;  %v358_v30 = vsel %vm353_vm0, %v1655_v25, %v1656_v24  ;;  %v2133_v21 = vmov 0   ;;  %v2376_v24 = vld [vmem:[%s3511_s2] sm:$0xff] }
  0x89   : > { %397 = vmatpush.msra.mxu1 %v357_v29  ;;  %377 = vmatpush.msra.mxu0 %v358_v30  ;;  %v2134_v29 = vmov 2  }
  0x8a   : > { %418 = vmatpush.msra.mxu2 %v337_v28  ;;  %1752 = vset.pattern.permute.xlu1 %v2133_v21 }
  0x8b   : > { %363 = vperm.xlu1 %1752, %v2376_v24   ;;  %1754 = vset.pattern.permute.xlu0 %v2134_v29 }
  0x8c   : > { %v2271_v32 = vpop.permute.xlu1 %1668  ;;  %419 = vmatpush.msra.mxu2 %v318_v31  ;;  %501 = vperm.xlu0 %1754, %v2376_v24  }
  0x8d   : > { %v1670_v33 = vunpack.i.l.bf16 %v2271_v32  ;;  %v2274_v34 = vpop.permute.xlu0 %1658  ;;  %v2276_v35 = vpop.permute.xlu2 %1723 }
  0x8e   : > { %v1661_v38 = vunpack.i.h.bf16 %v2274_v34  ;;  %v1660_v39 = vunpack.i.l.bf16 %v2274_v34  ;;  %v1726_v54 = vunpack.i.h.bf16 %v2276_v35  ;;  %v1725_v60 = vunpack.i.l.bf16 %v2276_v35 }
  0x8f   : > { %v355_v40 = vsel %vm353_vm0, %v1666_v20, %v1670_v33 }
  0x90   : > { %v339_v41 = vsel %vm334_vm1, %v1660_v39, %v1661_v38  ;;  %v338_v42 = vsel %vm334_vm1, %v1661_v38, %v1680_v18  ;;  %437 = vmatpush.msra.mxu3 %v355_v40  ;;  %v281_v9 = vsel %vm277_vm4, %v1725_v60, %v1726_v54 }
  0x91   : > { %378 = vmatpush.msra.mxu0 %v339_v41  ;;  %398 = vmatpush.msra.mxu1 %v338_v42  ;;  %v1671_v41 = vunpack.i.h.bf16 %v2271_v32 }
  0x93   : > { %379 = vmatpush.msra.mxu0 %v320_v43  ;;  %399 = vmatpush.msra.mxu1 %v319_v44 }
  0x94   : > { %v2298_v45 = vpop.permute.xlu1 %1688 }
  0x95   : > { %v1691_v46 = vunpack.i.h.bf16 %v2298_v45  ;;  %v1690_v47 = vunpack.i.l.bf16 %v2298_v45  ;;  %v2303_v48 = vpop.permute.xlu0 %1683  ;;  %v2306_v50 = vpop.permute.xlu2 %1733 }
  0x96   : > { %v1685_v49 = vunpack.i.l.bf16 %v2303_v48  ;;  %v1736_v61 = vunpack.i.h.bf16 %v2306_v50  ;;  %v1735_v5 = vunpack.i.l.bf16 %v2306_v50  ;;  %v354_v50 = vsel %vm353_vm0, %v1670_v33, %v1671_v41 }
  0x97   : > { %v301_v51 = vsel %vm296_vm3, %v1690_v47, %v1691_v46 }
  0x98   : > { %380 = vmatpush.msra.mxu0 %v301_v51  ;;  %v336_v52 = vsel %vm334_vm1, %v1681_v16, %v1685_v49  ;;  %v262_v13 = vsel %vm258_vm5, %v1735_v5, %v1736_v61  ;;  %v2135_v51 = vmov 1  }
  0x99   : > { %438 = vmatpush.msra.mxu3 %v336_v52  ;;  %1753 = vset.pattern.permute.xlu2 %v2135_v51 }
  0x9a   : > { %381 = vmatpush.msra.mxu0 %v2186_v2  ;;  %491 = vperm.xlu2 %1753, %v2376_v24  }
  0x9c   : > { %v1704_v53 = vpop.permute.xlu1 %1703 }
  0x9d   : > { %v1706_v55 = vunpack.i.h.bf16 %v1704_v53  ;;  %v1705_v56 = vunpack.i.l.bf16 %v1704_v53  ;;  %v2318_v57 = vpop.permute.xlu0 %1698  ;;  %v2328_v2 = vpop.permute.xlu2 %1743 }
  0x9e   : > { %v1700_v59 = vunpack.i.l.bf16 %v2318_v57  ;;  %v1746_v8 = vunpack.i.h.bf16 %v2328_v2  ;;  %v1745_v12 = vunpack.i.l.bf16 %v2328_v2 }
  0x9f   : > { %v300_v62 = vsel %vm296_vm3, %v1691_v46, %v1705_v56  ;;  %v299_v63 = vsel %vm296_vm3, %v1705_v56, %v1706_v55  ;;  %v298_v10 = vsel %vm296_vm3, %v1706_v55, %v1710_v58  ;;  %v1686_v55 = vunpack.i.h.bf16 %v2303_v48 }
  0xa0   : > { %400 = vmatpush.msra.mxu1 %v300_v62  ;;  %420 = vmatpush.msra.mxu2 %v299_v63  ;;  %v317_v3 = vsel %vm315_vm2, %v1696_v19, %v1700_v59  ;;  %v1701_v56 = vunpack.i.h.bf16 %v2318_v57 }
  0xa1   : > { %439 = vmatpush.msra.mxu3 %v317_v3 }
  0xa2   : > { %401 = vmatpush.msra.mxu1 %v2190_v4  ;;  %421 = vmatpush.msra.mxu2 %v2182_v0  ;;  %v243_v0 = vsel %vm239_vm6, %v1745_v12, %v1746_v8  ;;  %v316_v32 = vsel %vm315_vm2, %v1700_v59, %v1701_v56 }
  0xa3   : > { %440 = vmatpush.msra.mxu3 %v298_v10  ;;  %v321_v10 = vsel %vm315_vm2, %v1701_v56, %v1675_v37 }
  0xa4   : > { %v2353_v14 = vpop.permute.xlu1 %1718  ;;  %422 = vmatpush.msra.mxu2 %v281_v9 }
  0xa5   : > { %v2356_v16 = vpop.permute.xlu0 %1713  ;;  %441 = vmatpush.msra.mxu3 %v2184_v1  ;;  %v1721_v4 = vunpack.i.h.bf16 %v2353_v14  ;;  %v1720_v17 = vunpack.i.l.bf16 %v2353_v14 }
  0xa6   : > { %v1716_v18 = vunpack.i.h.bf16 %v2356_v16  ;;  %v1715_v19 = vunpack.i.l.bf16 %v2356_v16  ;;  %423 = vmatpush.msra.mxu2 %v262_v13 }
  0xa7   : > { %v264_v26 = vsel %vm258_vm5, %v1721_v4, %v1720_v17  ;;  %v263_v27 = vsel %vm258_vm5, %v1720_v17, %v1735_v5  ;;  %v213_v5 = vpop.permute.xlu2 %212 }
  0xa8   : > { %v283_v20 = vsel %vm277_vm4, %v1716_v18, %v1715_v19  ;;  %v282_v1 = vsel %vm277_vm4, %v1715_v19, %v1725_v60  ;;  %424 = vmatpush.msra.mxu2 %v243_v0  ;;  %v335_v60 = vsel %vm334_vm1, %v1685_v49, %v1686_v55 }
  0xa9   : > { %382 = vmatpush.msra.mxu0 %v283_v20  ;;  %402 = vmatpush.msra.mxu1 %v282_v1 }
  0xab   : > { %383 = vmatpush.msra.mxu0 %v264_v26  ;;  %403 = vmatpush.msra.mxu1 %v263_v27 }
  0xac   : > { %v2385_v28 = vpop.permute.xlu1 %1728 }
  0xad   : > { %v1731_v30 = vunpack.i.h.bf16 %v2385_v28  ;;  %v1730_v31 = vunpack.i.l.bf16 %v2385_v28  ;;  %v272_v35 = vpop.permute.xlu0 %271 }
  0xae   : > { %v280_v36 = vsel %vm277_vm4, %v1726_v54, %v272_v35  ;;  %v360_v54 = vld [vmem:[%s3510_s1] sm:$0xff] }
  0xaf   : > { %442 = vmatpush.msra.mxu3 %v280_v36  ;;  %v245_v38 = vsel %vm239_vm6, %v1731_v30, %v1730_v31  ;;  %v244_v40 = vsel %vm239_vm6, %v1730_v31, %v1745_v12  ;;  %v236_v34 = vpop.permute.xlu2 %235 }
  0xb0   : > { %384 = vmatpush.msra.mxu0 %v245_v38  ;;  %404 = vmatpush.msra.mxu1 %v244_v40 }
  0xb4   : > { %v2399_v42 = vpop.permute.xlu1 %1738 }
  0xb5   : > { %v1741_v43 = vunpack.i.h.bf16 %v2399_v42  ;;  %v1740_v44 = vunpack.i.l.bf16 %v2399_v42  ;;  %v253_v46 = vpop.permute.xlu0 %252 }
  0xb6   : > { %v261_v52 = vsel %vm258_vm5, %v1736_v61, %v253_v46  ;;  %v1711_v61 = vunpack.i.h.bf16 %v2250_v23  ;;  %v359_v23 = vsel %vm353_vm0, %v1671_v41, %v1655_v25 }
  0xb7   : > { %443 = vmatpush.msra.mxu3 %v261_v52  ;;  %v226_v53 = vsel %vm220_vm7, %v1741_v43, %v1740_v44 }
  0xb8   : > { %385 = vmatpush.msra.mxu0 %v226_v53  ;;  %v297_v49 = vsel %vm296_vm3, %v1710_v58, %v1711_v61  ;;  %v340_v58 = vsel %vm334_vm1, %v1686_v55, %v1660_v39  ;;  %v198_v53 = vld [vmem:[%s3512_s3] sm:$0x3f] }
  0xb9   : > { %1580 = vmatmul.msk.f32.vlgmr.msra.gmra.mxu0 %vm366_vm8, %v360_v54 }
  0xba   : > { %457 = vmatpush.msrb.mxu0 %v354_v50 }
  0xbc   : > { %458 = vmatpush.msrb.mxu0 %v335_v60  ;;  %v1749_v62 = vpop.permute.xlu1 %1748 }
  0xbd   : > { %v1751_v33 = vunpack.i.h.bf16 %v1749_v62  ;;  %v1750_v63 = vunpack.i.l.bf16 %v1749_v62  ;;  %v234_v3 = vpop.permute.xlu0 %233 }
  0xbe   : > { %459 = vmatpush.msrb.mxu0 %v316_v32  ;;  %v242_v48 = vsel %vm239_vm6, %v1746_v8, %v234_v3  ;;  %v241_v11 = vsel %vm239_vm6, %v234_v3, %v236_v34  ;;  %v2513_v32 = vperm.slane %v198_v53, 1 }
  0xbf   : > { %444 = vmatpush.msra.mxu3 %v242_v48  ;;  %v225_v57 = vsel %vm220_vm7, %v1740_v44, %v1750_v63  ;;  %v224_v59 = vsel %vm220_vm7, %v1750_v63, %v1751_v33  ;;  %v223_v9 = vsel %vm220_vm7, %v1751_v33, %v213_v5 }
  0xc0   : > { %460 = vmatpush.msrb.mxu0 %v297_v49  ;;  %405 = vmatpush.msra.mxu1 %v225_v57 }
  0xc1   : > { %425 = vmatpush.msra.mxu2 %v224_v59  ;;  %445 = vmatpush.msra.mxu3 %v223_v9 }
  0xc2   : > { %1581 = vmatmul.msk.f32.vlgmr.msra.gmra.mxu1 %vm366_vm8, %v360_v54  ;;  %1582 = vmatmul.msk.f32.vlgmr.msra.gmra.mxu2 %vm366_vm8, %v360_v54 }
  0xc3   : > { %1583 = vmatmul.msk.f32.vlgmr.msra.gmra.mxu3 %vm366_vm8, %v360_v54  ;;  %477 = vmatpush.msrb.mxu1 %v359_v23 }
  0xc4   : > { %461 = vmatpush.msrb.mxu0 %v2197_v6  ;;  %v255_v2 = vpop.permute.xlu1 %254  ;;  %v302_v6 = vsel %vm296_vm3, %v1711_v61, %v1690_v47  ;;  %v2511_v61 = vperm.slane %v198_v53, 0 }
  0xc5   : > { %478 = vmatpush.msrb.mxu1 %v340_v58  ;;  %v274_v8 = vpop.permute.xlu0 %273  ;;  %v260_v25 = vsel %vm258_vm5, %v253_v46, %v255_v2  ;;  %v259_v45 = vsel %vm258_vm5, %v255_v2, %v1721_v4 }
  0xc6   : > { %v279_v22 = vsel %vm277_vm4, %v272_v35, %v274_v8  ;;  %v278_v37 = vsel %vm277_vm4, %v274_v8, %v1716_v18 }
  0xc7   : > { %479 = vmatpush.msrb.mxu1 %v321_v10  ;;  %462 = vmatpush.msrb.mxu0 %v279_v22 }
  0xc9   : > { %480 = vmatpush.msrb.mxu1 %v302_v6  ;;  %463 = vmatpush.msrb.mxu0 %v260_v25  ;;  %v2526_v25 = vperm.slane %v198_v53, 2 }
  0xcb   : > { %481 = vmatpush.msrb.mxu1 %v2199_v7  ;;  %464 = vmatpush.msrb.mxu0 %v241_v11  ;;  %v240_v7 = vsel %vm239_vm6, %v236_v34, %v1731_v30 }
  0xcd   : > { %482 = vmatpush.msrb.mxu1 %v278_v37  ;;  %v215_v39 = vpop.permute.xlu0 %214 }
  0xce   : > { %v222_v47 = vsel %vm220_vm7, %v213_v5, %v215_v39  ;;  %v221_v12 = vsel %vm220_vm7, %v215_v39, %v1741_v43  ;;  %v2528_v39 = vperm.slane %v198_v53, 3 }
  0xcf   : > { %483 = vmatpush.msrb.mxu1 %v259_v45  ;;  %465 = vmatpush.msrb.mxu0 %v222_v47 }
  0xd0   : > { %1584 = vmatmul.msk.f32.vlgmr.msrb.gmra.mxu0 %vm366_vm8, %v360_v54 }
  0xd1   : > { %484 = vmatpush.msrb.mxu1 %v240_v7 }
  0xd3   : > { %485 = vmatpush.msrb.mxu1 %v221_v12 }
  0xd4   : > { %1585 = vmatmul.msk.f32.vlgmr.msrb.gmra.mxu1 %vm366_vm8, %v360_v54 }
  0xf4   : > { %v492_v16 = vpop.permute.xlu2 %491 }
  0xfd   : > { %v364_v13 = vpop.permute.xlu1 %363 }
  0xfe   : > { %v502_v4 = vpop.permute.xlu0 %501 }
 0x136   : > { %v387_v14 = vpop.f32.mrf.mxu0 }
 0x137   : > { %v2493_v0 = vadd.f32 %v387_v14, %v364_v13 }
 0x139   : > { %v494_v17 = vmul.f32 %v492_v16, %v2493_v0 }
 0x13b   : > { %v504_v18 = vadd.f32 %v502_v4, %v494_v17 }
 0x13d   : > { %v516_v19 = vmul.f32 1.442695, %v504_v18  ;;  %vm510_vm9 = vcmp.gt.f32.partialorder %v504_v18, 0.0 }
 0x13f   : > { %v407_v20 = vpop.f32.mrf.mxu1  ;;  %2080 = vpow2.f32 %v516_v19 }
 0x140   : > { %v2496_v1 = vadd.f32 %v407_v20, %v364_v13 }
 0x142   : > { %v495_v21 = vmul.f32 %v492_v16, %v2496_v1 }
 0x144   : > { %v505_v26 = vadd.f32 %v502_v4, %v495_v21 }
 0x145   : > { %v427_v28 = vpop.f32.mrf.mxu2  ;;  %v2081_v30 = vpop.eup %2080 }
 0x146   : > { %v518_v27 = vmul.f32 1.442695, %v505_v26  ;;  %v447_v29 = vpop.f32.mrf.mxu3  ;;  %v2499_v31 = vadd.f32 %v427_v28, %v364_v13  ;;  %v1586_v36 = vadd.f32 -1.0, %v2081_v30  ;;  %vm511_vm10 = vcmp.gt.f32.partialorder %v505_v26, 0.0 }
 0x147   : > { %v2501_v35 = vadd.f32 %v447_v29, %v364_v13  ;;  %v2544_v28 = vperm.slane %v198_v53, 5 }
 0x148   : > { %2082 = vpow2.f32 %v518_v27  ;;  %v496_v38 = vmul.f32 %v492_v16, %v2499_v31  ;;  %v534_v41 = vmul.f32 1.6732632, %v1586_v36  ;;  %v2542_v27 = vperm.slane %v198_v53, 4 }
 0x149   : > { %v497_v40 = vmul.f32 %v492_v16, %v2501_v35 }
 0x14a   : > { %v506_v42 = vadd.f32 %v502_v4, %v496_v38  ;;  %v540_v54 = vsel %vm510_vm9, %v504_v18, %v534_v41 }
 0x14b   : > { %v507_v43 = vadd.f32 %v502_v4, %v497_v40  ;;  %v546_v62 = vmul.f32 1.050701, %v540_v54 }
 0x14c   : > { %v520_v44 = vmul.f32 1.442695, %v506_v42  ;;  %vm512_vm11 = vcmp.gt.f32.partialorder %v506_v42, 0.0 }
 0x14d   : > { %v522_v51 = vmul.f32 1.442695, %v507_v43  ;;  %v467_v52 = vpop.f32.mrf.mxu0  ;;  %v2519_v23 = vmul.f32 %v2511_v61, %v546_v62  ;;  %vm513_vm12 = vcmp.gt.f32.partialorder %v507_v43, 0.0 }
 0x14e   : > { %v2083_v46 = vpop.eup %2082  ;;  %2084 = vpow2.f32 %v520_v44  ;;  %v2508_v50 = vadd.f32 %v467_v52, %v364_v13 }
 0x14f   : > { %v1587_v55 = vadd.f32 -1.0, %v2083_v46  ;;  %2086 = vpow2.f32 %v522_v51 }
 0x150   : > { %v498_v60 = vmul.f32 %v492_v16, %v2508_v50 }
 0x151   : > { %v535_v56 = vmul.f32 1.6732632, %v1587_v55  ;;  %v487_v33 = vpop.f32.mrf.mxu1 }
 0x152   : > { %v508_v3 = vadd.f32 %v502_v4, %v498_v60  ;;  %v2515_v5 = vadd.f32 %v487_v33, %v364_v13 }
 0x153   : > { %v541_v63 = vsel %vm511_vm10, %v505_v26, %v535_v56 }
 0x154   : > { %v547_v48 = vmul.f32 1.050701, %v541_v63  ;;  %v2085_v49 = vpop.eup %2084  ;;  %v524_v57 = vmul.f32 1.442695, %v508_v3  ;;  %v499_v59 = vmul.f32 %v492_v16, %v2515_v5  ;;  %vm514_vm13 = vcmp.gt.f32.partialorder %v508_v3, 0.0 }
 0x155   : > { %v2087_v9 = vpop.eup %2086  ;;  %v1588_v2 = vadd.f32 -1.0, %v2085_v49 }
 0x156   : > { %v2522_v58 = vmul.f32 %v2513_v32, %v547_v48  ;;  %v1589_v8 = vadd.f32 -1.0, %v2087_v9  ;;  %2088 = vpow2.f32 %v524_v57  ;;  %v509_v10 = vadd.f32 %v502_v4, %v499_v59 }
 0x157   : > { %v536_v22 = vmul.f32 1.6732632, %v1588_v2 }
 0x158   : > { %v1760_v6 = vpack.i.bf16 %v2522_v58, %v2519_v23  ;;  %v537_v34 = vmul.f32 1.6732632, %v1589_v8  ;;  %v526_v11 = vmul.f32 1.442695, %v509_v10  ;;  %vm515_vm14 = vcmp.gt.f32.partialorder %v509_v10, 0.0 }
 0x159   : > { %v542_v37 = vsel %vm512_vm11, %v506_v42, %v536_v22 }
 0x15a   : > { %1761 = vrot.lane.b32.xlu2 %v1760_v6, %s2127_s23  ;;  %1756 = vrot.lane.b32.xlu1 %v1760_v6, %s2125_s21  ;;  %v548_v45 = vmul.f32 1.050701, %v542_v37  ;;  %v543_v47 = vsel %vm513_vm12, %v507_v43, %v537_v34  ;;  %2090 = vpow2.f32 %v526_v11 }
 0x15b   : > { %v549_v7 = vmul.f32 1.050701, %v543_v47 }
 0x15c   : > { %v2089_v12 = vpop.eup %2088  ;;  %v2533_v13 = vmul.f32 %v2526_v25, %v548_v45 }
 0x15d   : > { %v2536_v14 = vmul.f32 %v2528_v39, %v549_v7  ;;  %v1590_v16 = vadd.f32 -1.0, %v2089_v12 }
 0x15f   : > { %v538_v4 = vmul.f32 1.6732632, %v1590_v16  ;;  %v1800_v17 = vpack.i.bf16 %v2536_v14, %v2533_v13 }
 0x160   : > { %v2091_v18 = vpop.eup %2090 }
 0x161   : > { %v544_v19 = vsel %vm514_vm13, %v508_v3, %v538_v4  ;;  %v1591_v20 = vadd.f32 -1.0, %v2091_v18  ;;  %1801 = vrot.lane.b32.xlu0 %v1800_v17, %s2127_s23 }
 0x162   : > { %1766 = vrot.lane.b32.xlu2 %v1760_v6, %s2126_s22  ;;  %v550_v26 = vmul.f32 1.050701, %v544_v19 }
 0x163   : > { %v539_v21 = vmul.f32 1.6732632, %v1591_v20 }
 0x164   : > { %v2547_v36 = vmul.f32 %v2542_v27, %v550_v26 }
 0x165   : > { %v545_v29 = vsel %vm515_vm14, %v509_v10, %v539_v21 }
 0x166   : > { %v551_v30 = vmul.f32 1.050701, %v545_v29 }
 0x168   : > { %v2550_v38 = vmul.f32 %v2544_v28, %v551_v30 }
 0x169   : > { %1806 = vrot.lane.b32.xlu0 %v1800_v17, %s2126_s22 }
 0x16a   : > { %1771 = vrot.lane.b32.xlu2 %v1760_v6, %s2128_s24  ;;  %v1835_v40 = vpack.i.bf16 %v2550_v38, %v2547_v36 }
 0x16c   : > { %1836 = vrot.lane.b32.xlu1 %v1835_v40, %s2125_s21 }
 0x171   : > { %1811 = vrot.lane.b32.xlu0 %v1800_v17, %s2128_s24 }
 0x172   : > { %1776 = vrot.lane.b32.xlu2 %v1760_v6, %s2130_s26 }
 0x174   : > { %1841 = vrot.lane.b32.xlu1 %v1835_v40, %s2127_s23 }
 0x179   : > { %1816 = vrot.lane.b32.xlu0 %v1800_v17, %s2130_s26 }
 0x17a   : > { %1781 = vrot.lane.b32.xlu2 %v1760_v6, %s2129_s25 }
 0x17c   : > { %1846 = vrot.lane.b32.xlu1 %v1835_v40, %s2126_s22 }
 0x181   : > { %1821 = vrot.lane.b32.xlu0 %v1800_v17, %s2129_s25 }
 0x182   : > { %1786 = vrot.lane.b32.xlu2 %v1760_v6, %s2131_s27 }
 0x184   : > { %1851 = vrot.lane.b32.xlu1 %v1835_v40, %s2128_s24 }
 0x189   : > { %1826 = vrot.lane.b32.xlu0 %v1800_v17, %s2131_s27 }
 0x18a   : > { %1791 = vrot.lane.b32.xlu2 %v1800_v17, %s2125_s21 }
 0x18c   : > { %635 = vrot.lane.b32.xlu1 %v2550_v38, %s2130_s26 }
 0x191   : > { %1831 = vrot.lane.b32.xlu0 %v1800_v17, %s2132_s28 }
 0x192   : > { %1796 = vrot.lane.b32.xlu2 %v1760_v6, %s2132_s28 }
 0x194   : > { %617 = vrot.lane.b32.xlu1 %v2550_v38, %s2129_s25 }
 0x199   : > { %615 = vrot.lane.b32.xlu0 %v2547_v36, %s2129_s25 }
 0x19a   : > { %633 = vrot.lane.b32.xlu2 %v2547_v36, %s2130_s26 }
 0x19c   : > { %599 = vrot.lane.b32.xlu1 %v2550_v38, %s2131_s27 }
 0x1a2   : > { %579 = vrot.lane.b32.xlu2 %v2547_v36, %s2132_s28 }
 0x1a4   : > { %581 = vrot.lane.b32.xlu1 %v2550_v38, %s2132_s28 }
 0x1ac   : > { %597 = vrot.lane.b32.xlu1 %v2547_v36, %s2131_s27 }
 0x1b4   : > { %v2586_v41 = vpop.permute.xlu2 %1761 }
 0x1b5   : > { %v1764_v51 = vunpack.i.h.bf16 %v2586_v41  ;;  %v1763_v52 = vunpack.i.l.bf16 %v2586_v41 }
 0x1b7   : > { %v695_v63 = vsel %vm334_vm1, %v1763_v52, %v1764_v51 }
 0x1bc   : > { %v2588_v42 = vpop.permute.xlu2 %1766 }
 0x1bd   : > { %v1769_v55 = vunpack.i.h.bf16 %v2588_v42  ;;  %v1768_v56 = vunpack.i.l.bf16 %v2588_v42 }
 0x1bf   : > { %v677_v3 = vsel %vm315_vm2, %v1768_v56, %v1769_v55 }
 0x1c4   : > { %v2590_v43 = vpop.permute.xlu2 %1771 }
 0x1c5   : > { %v1774_v62 = vunpack.i.h.bf16 %v2590_v43  ;;  %v1773_v33 = vunpack.i.l.bf16 %v2590_v43 }
 0x1c7   : > { %v659_v57 = vsel %vm296_vm3, %v1773_v33, %v1774_v62 }
 0x1cc   : > { %v2592_v44 = vpop.permute.xlu2 %1776  ;;  %v2594_v46 = vpop.permute.xlu1 %1756 }
 0x1cd   : > { %v1759_v53 = vunpack.i.h.bf16 %v2594_v46  ;;  %v1758_v54 = vunpack.i.l.bf16 %v2594_v46  ;;  %v1779_v30 = vunpack.i.h.bf16 %v2592_v44  ;;  %v1778_v40 = vunpack.i.l.bf16 %v2592_v44 }
 0x1cf   : > { %v713_v60 = vsel %vm353_vm0, %v1758_v54, %v1759_v53 }
 0x1d0   : > { %731 = vmatpush.msrb.mxu2 %v713_v60 }
 0x1d2   : > { %732 = vmatpush.msrb.mxu2 %v695_v63 }
 0x1d3   : > { %v1802_v48 = vpop.permute.xlu0 %1801 }
 0x1d4   : > { %v2616_v49 = vpop.permute.xlu2 %1781  ;;  %733 = vmatpush.msrb.mxu2 %v677_v3  ;;  %v1804_v8 = vunpack.i.h.bf16 %v1802_v48  ;;  %v1803_v6 = vunpack.i.l.bf16 %v1802_v48 }
 0x1d5   : > { %v1784_v63 = vunpack.i.h.bf16 %v2616_v49  ;;  %v1783_v3 = vunpack.i.l.bf16 %v2616_v49 }
 0x1d6   : > { %734 = vmatpush.msrb.mxu2 %v659_v57  ;;  %v694_v19 = vsel %vm334_vm1, %v1764_v51, %v1803_v6  ;;  %v693_v20 = vsel %vm334_vm1, %v1803_v6, %v1804_v8 }
 0x1d8   : > { %735 = vmatpush.msrb.mxu2 %v2519_v23 }
 0x1db   : > { %v1807_v59 = vpop.permute.xlu0 %1806 }
 0x1dc   : > { %v2623_v9 = vpop.permute.xlu2 %1786  ;;  %v1809_v45 = vunpack.i.h.bf16 %v1807_v59  ;;  %v1808_v47 = vunpack.i.l.bf16 %v1807_v59 }
 0x1de   : > { %v2625_v2 = vpop.permute.xlu1 %1836  ;;  %v676_v26 = vsel %vm315_vm2, %v1769_v55, %v1808_v47  ;;  %v675_v29 = vsel %vm315_vm2, %v1808_v47, %v1809_v45  ;;  %v2136_v47 = vmov 3  }
 0x1df   : > { %v1838_v34 = vunpack.i.l.bf16 %v2625_v2  ;;  %1855 = vset.pattern.permute.xlu0 %v2136_v47 }
 0x1e0   : > { %718 = vperm.xlu0 %1855, %v2376_v24  }
 0x1e3   : > { %v2627_v10 = vpop.permute.xlu0 %1811 }
 0x1e4   : > { %v1792_v22 = vpop.permute.xlu2 %1791  ;;  %v1814_v17 = vunpack.i.h.bf16 %v2627_v10  ;;  %v1813_v18 = vunpack.i.l.bf16 %v2627_v10 }
 0x1e5   : > { %v1794_v11 = vunpack.i.h.bf16 %v1792_v22  ;;  %v1793_v37 = vunpack.i.l.bf16 %v1792_v22  ;;  %v1788_v22 = vunpack.i.l.bf16 %v2623_v9 }
 0x1e6   : > { %v2630_v7 = vpop.permute.xlu1 %1841  ;;  %v658_v60 = vsel %vm296_vm3, %v1774_v62, %v1813_v18  ;;  %v657_v55 = vsel %vm296_vm3, %v1813_v18, %v1814_v17  ;;  %v641_v62 = vsel %vm277_vm4, %v1778_v40, %v1779_v30  ;;  %v2137_v18 = vmov 4  }
 0x1e7   : > { %v712_v23 = vsel %vm353_vm0, %v1759_v53, %v1793_v37  ;;  %v711_v12 = vsel %vm353_vm0, %v1793_v37, %v1794_v11  ;;  %v710_v16 = vsel %vm353_vm0, %v1794_v11, %v1838_v34  ;;  %v1843_v4 = vunpack.i.l.bf16 %v2630_v7  ;;  %1856 = vset.pattern.permute.xlu1 %v2137_v18 }
 0x1e8   : > { %751 = vmatpush.msrb.mxu3 %v712_v23  ;;  %771 = vmatpush.msra.mxu0 %v711_v12  ;;  %v623_v37 = vsel %vm258_vm5, %v1783_v3, %v1784_v63  ;;  %v1839_v23 = vunpack.i.h.bf16 %v2625_v2 }
 0x1e9   : > { %791 = vmatpush.msra.mxu1 %v710_v16  ;;  %v692_v21 = vsel %vm334_vm1, %v1804_v8, %v1843_v4  ;;  %v1789_v8 = vunpack.i.h.bf16 %v2623_v9  ;;  %845 = vperm.xlu1 %1856, %v2376_v24  }
 0x1ea   : > { %752 = vmatpush.msrb.mxu3 %v694_v19  ;;  %772 = vmatpush.msra.mxu0 %v693_v20  ;;  %v1844_v19 = vunpack.i.h.bf16 %v2630_v7 }
 0x1eb   : > { %792 = vmatpush.msra.mxu1 %v692_v21  ;;  %v2657_v51 = vpop.permute.xlu0 %1816  ;;  %v605_v16 = vsel %vm239_vm6, %v1788_v22, %v1789_v8 }
 0x1ec   : > { %753 = vmatpush.msrb.mxu3 %v676_v26  ;;  %773 = vmatpush.msra.mxu0 %v675_v29  ;;  %v1818_v53 = vunpack.i.l.bf16 %v2657_v51  ;;  %v2670_v57 = vpop.permute.xlu2 %1796  ;;  %v2717_v29 = vld [vmem:[%s3510_s1 + $0x8] sm:$0xff]  ;;  %v696_v46 = vsel %vm334_vm1, %v1844_v19, %v1763_v52  ;;  %v691_v9 = vsel %vm334_vm1, %v1843_v4, %v1844_v19 }
 0x1ee   : > { %754 = vmatpush.msrb.mxu3 %v658_v60  ;;  %774 = vmatpush.msra.mxu0 %v657_v55  ;;  %v2668_v48 = vpop.permute.xlu1 %1846  ;;  %v640_v6 = vsel %vm277_vm4, %v1779_v30, %v1818_v53  ;;  %v714_v55 = vsel %vm353_vm0, %v1839_v23, %v1758_v54 }
 0x1ef   : > { %v1848_v59 = vunpack.i.l.bf16 %v2668_v48  ;;  %v1849_v30 = vunpack.i.h.bf16 %v2668_v48 }
 0x1f0   : > { %755 = vmatpush.msrb.mxu3 %v2522_v58  ;;  %775 = vmatpush.msra.mxu0 %v2533_v13  ;;  %v1799_v58 = vunpack.i.h.bf16 %v2670_v57  ;;  %v1798_v13 = vunpack.i.l.bf16 %v2670_v57 }
 0x1f1   : > { %v674_v11 = vsel %vm315_vm2, %v1809_v45, %v1848_v59  ;;  %v678_v41 = vsel %vm315_vm2, %v1849_v30, %v1768_v56  ;;  %v673_v57 = vsel %vm315_vm2, %v1848_v59, %v1849_v30 }
 0x1f2   : > { %756 = vmatpush.msrb.mxu3 %v641_v62  ;;  %776 = vmatpush.msra.mxu0 %v640_v6  ;;  %v587_v26 = vsel %vm220_vm7, %v1798_v13, %v1799_v58 }
 0x1f3   : > { %793 = vmatpush.msra.mxu1 %v674_v11  ;;  %v2694_v12 = vpop.permute.xlu0 %1821 }
 0x1f4   : > { %757 = vmatpush.msrb.mxu3 %v623_v37  ;;  %v1823_v45 = vunpack.i.l.bf16 %v2694_v12  ;;  %v1824_v54 = vunpack.i.h.bf16 %v2694_v12 }
 0x1f6   : > { %758 = vmatpush.msrb.mxu3 %v605_v16  ;;  %v2704_v20 = vpop.permute.xlu1 %1851  ;;  %v622_v21 = vsel %vm258_vm5, %v1784_v63, %v1823_v45  ;;  %v1819_v63 = vunpack.i.h.bf16 %v2657_v51  ;;  %v621_v43 = vsel %vm258_vm5, %v1823_v45, %v1824_v54 }
 0x1f7   : > { %v1853_v60 = vunpack.i.l.bf16 %v2704_v20  ;;  %777 = vmatpush.msra.mxu0 %v622_v21  ;;  %v1854_v62 = vunpack.i.h.bf16 %v2704_v20 }
 0x1f8   : > { %759 = vmatpush.msrb.mxu3 %v587_v26  ;;  %v2138_v26 = vmov 5  }
 0x1f9   : > { %v656_v6 = vsel %vm296_vm3, %v1814_v17, %v1853_v60  ;;  %1594 = vmatmul.msk.f32.vlgmr.msrb.gmra.mxu3 %vm366_vm8, %v2717_v29  ;;  %v639_v17 = vsel %vm277_vm4, %v1818_v53, %v1819_v63  ;;  %v660_v42 = vsel %vm296_vm3, %v1854_v62, %v1773_v33  ;;  %v634_v33 = vpop.permute.xlu2 %633  ;;  %1857 = vset.pattern.permute.xlu2 %v2138_v26 }
 0x1fa   : > { %831 = vmatpush.msra.mxu3 %v714_v55  ;;  %794 = vmatpush.msra.mxu1 %v656_v6  ;;  %v638_v59 = vsel %vm277_vm4, %v1819_v63, %v634_v33 }
 0x1fb   : > { %v2744_v11 = vpop.permute.xlu0 %1826  ;;  %855 = vperm.xlu2 %1857, %v2376_v24   ;;  %v709_v24 = vsel %vm353_vm0, %v1838_v34, %v1839_v23  ;;  %v655_v34 = vsel %vm296_vm3, %v1853_v60, %v1854_v62 }
 0x1fc   : > { %832 = vmatpush.msra.mxu3 %v696_v46  ;;  %v1828_v10 = vunpack.i.l.bf16 %v2744_v11  ;;  %795 = vmatpush.msra.mxu1 %v2536_v14  ;;  %v1829_v52 = vunpack.i.h.bf16 %v2744_v11 }
 0x1fe   : > { %833 = vmatpush.msra.mxu3 %v678_v41  ;;  %v636_v56 = vpop.permute.xlu1 %635  ;;  %796 = vmatpush.msra.mxu1 %v639_v17  ;;  %v604_v14 = vsel %vm239_vm6, %v1789_v8, %v1828_v10  ;;  %v603_v53 = vsel %vm239_vm6, %v1828_v10, %v1829_v52 }
 0x1ff   : > { %778 = vmatpush.msra.mxu0 %v604_v14  ;;  %v642_v37 = vsel %vm277_vm4, %v636_v56, %v1778_v40  ;;  %v637_v44 = vsel %vm277_vm4, %v634_v33, %v636_v56 }
 0x200   : > { %834 = vmatpush.msra.mxu3 %v660_v42  ;;  %736 = vmatpush.msrb.mxu2 %v642_v37 }
 0x201   : > { %797 = vmatpush.msra.mxu1 %v621_v43  ;;  %v580_v4 = vpop.permute.xlu2 %579 }
 0x202   : > { %835 = vmatpush.msra.mxu3 %v2550_v38 }
 0x203   : > { %798 = vmatpush.msra.mxu1 %v603_v53  ;;  %v1832_v40 = vpop.permute.xlu0 %1831 }
 0x204   : > { %836 = vmatpush.msra.mxu3 %v637_v44  ;;  %v1834_v8 = vunpack.i.h.bf16 %v1832_v40  ;;  %v1833_v47 = vunpack.i.l.bf16 %v1832_v40 }
 0x206   : > { %v618_v16 = vpop.permute.xlu1 %617  ;;  %v586_v45 = vsel %vm220_vm7, %v1799_v58, %v1833_v47  ;;  %v585_v18 = vsel %vm220_vm7, %v1833_v47, %v1834_v8  ;;  %v584_v51 = vsel %vm220_vm7, %v1834_v8, %v580_v4 }
 0x207   : > { %779 = vmatpush.msra.mxu0 %v586_v45  ;;  %799 = vmatpush.msra.mxu1 %v585_v18  ;;  %v624_v38 = vsel %vm258_vm5, %v618_v16, %v1783_v3 }
 0x208   : > { %737 = vmatpush.msrb.mxu2 %v624_v38  ;;  %1595 = vmatmul.msk.f32.vlgmr.msra.gmra.mxu0 %vm366_vm8, %v2717_v29 }
 0x209   : > { %1596 = vmatmul.msk.f32.vlgmr.msra.gmra.mxu1 %vm366_vm8, %v2717_v29 }
 0x20b   : > { %v616_v21 = vpop.permute.xlu0 %615 }
 0x20c   : > { %v619_v58 = vsel %vm258_vm5, %v616_v21, %v618_v16 }
 0x20d   : > { %837 = vmatpush.msra.mxu3 %v619_v58 }
 0x20e   : > { %v600_v49 = vpop.permute.xlu1 %599 }
 0x20f   : > { %v606_v3 = vsel %vm239_vm6, %v600_v49, %v1788_v22  ;;  %v620_v22 = vsel %vm258_vm5, %v1824_v54, %v616_v21 }
 0x210   : > { %738 = vmatpush.msrb.mxu2 %v606_v3 }
 0x216   : > { %v582_v55 = vpop.permute.xlu1 %581 }
 0x217   : > { %v588_v6 = vsel %vm220_vm7, %v582_v55, %v1798_v13  ;;  %v583_v48 = vsel %vm220_vm7, %v580_v4, %v582_v55 }
 0x218   : > { %739 = vmatpush.msrb.mxu2 %v588_v6 }
 0x219   : > { %1593 = vmatmul.msk.f32.vlgmr.msrb.gmra.mxu2 %vm366_vm8, %v2717_v29 }
 0x21a   : > { %811 = vmatpush.msra.mxu2 %v709_v24 }
 0x21c   : > { %812 = vmatpush.msra.mxu2 %v691_v9 }
 0x21e   : > { %813 = vmatpush.msra.mxu2 %v673_v57  ;;  %v598_v2 = vpop.permute.xlu1 %597 }
 0x21f   : > { %v601_v7 = vsel %vm239_vm6, %v598_v2, %v600_v49 }
 0x220   : > { %814 = vmatpush.msra.mxu2 %v655_v34  ;;  %838 = vmatpush.msra.mxu3 %v601_v7 }
 0x222   : > { %815 = vmatpush.msra.mxu2 %v2547_v36  ;;  %839 = vmatpush.msra.mxu3 %v583_v48  ;;  %v602_v36 = vsel %vm239_vm6, %v1829_v52, %v598_v2 }
 0x223   : > { %1598 = vmatmul.msk.f32.vlgmr.msra.gmra.mxu3 %vm366_vm8, %v2717_v29 }
 0x224   : > { %816 = vmatpush.msra.mxu2 %v638_v59 }
 0x226   : > { %817 = vmatpush.msra.mxu2 %v620_v22 }
 0x228   : > { %818 = vmatpush.msra.mxu2 %v602_v36 }
 0x22a   : > { %819 = vmatpush.msra.mxu2 %v584_v51 }
 0x22b   : > { %1597 = vmatmul.msk.f32.vlgmr.msra.gmra.mxu2 %vm366_vm8, %v2717_v29 }
 0x252   : > { %v2856_v13 = vpop.permute.xlu0 %718 }
 0x255   : > { %v856_v46 = vpop.permute.xlu2 %855 }
 0x25b   : > { %v2859_v19 = vpop.permute.xlu1 %845 }
 0x27c   : > { %v761_v23 = vpop.f32.mrf.mxu3 }
 0x27d   : > { %v762_v12 = vadd.f32 %v761_v23, %v2856_v13 }
 0x27f   : > { %v849_v62 = vmul.f32 %v2859_v19, %v762_v12 }
 0x281   : > { %v859_v41 = vadd.f32 %v856_v46, %v849_v62 }
 0x283   : > { %v872_v42 = vmul.f32 1.442695, %v859_v41  ;;  %vm865_vm10 = vcmp.gt.f32.partialorder %v859_v41, 0.0 }
 0x285   : > { %v781_v20 = vpop.f32.mrf.mxu0 }
 0x286   : > { %v782_v30 = vadd.f32 %v781_v20, %v2856_v13  ;;  %v801_v60 = vpop.f32.mrf.mxu1 }
 0x287   : > { %v802_v63 = vadd.f32 %v801_v60, %v2856_v13 }
 0x288   : > { %v850_v54 = vmul.f32 %v2859_v19, %v782_v30 }
 0x289   : > { %v851_v29 = vmul.f32 %v2859_v19, %v802_v63 }
 0x28a   : > { %v860_v11 = vadd.f32 %v856_v46, %v850_v54 }
 0x28b   : > { %v861_v10 = vadd.f32 %v856_v46, %v851_v29 }
 0x28c   : > { %v874_v52 = vmul.f32 1.442695, %v860_v11  ;;  %vm866_vm15 = vcmp.gt.f32.partialorder %v860_v11, 0.0 }
 0x28d   : > { %v876_v17 = vmul.f32 1.442695, %v861_v10  ;;  %vm867_vm9 = vcmp.gt.f32.partialorder %v861_v10, 0.0 }
 0x28e   : > { %2092 = vpow2.f32 %v874_v52 }
 0x28f   : > { %2094 = vpow2.f32 %v876_v17 }
 0x290   : > { %2096 = vpow2.f32 %v872_v42 }
 0x294   : > { %v2093_v56 = vpop.eup %2092 }
 0x295   : > { %v2095_v14 = vpop.eup %2094  ;;  %v1601_v37 = vadd.f32 -1.0, %v2093_v56 }
 0x296   : > { %v1602_v43 = vadd.f32 -1.0, %v2095_v14  ;;  %v2097_v44 = vpop.eup %2096 }
 0x297   : > { %v890_v33 = vmul.f32 1.6732632, %v1601_v37  ;;  %v1600_v45 = vadd.f32 -1.0, %v2097_v44 }
 0x298   : > { %v891_v53 = vmul.f32 1.6732632, %v1602_v43 }
 0x299   : > { %v896_v40 = vsel %vm866_vm15, %v860_v11, %v890_v33  ;;  %v889_v3 = vmul.f32 1.6732632, %v1600_v45 }
 0x29a   : > { %v897_v8 = vsel %vm867_vm9, %v861_v10, %v891_v53  ;;  %v902_v47 = vmul.f32 1.050701, %v896_v40 }
 0x29b   : > { %v903_v16 = vmul.f32 1.050701, %v897_v8  ;;  %v895_v24 = vsel %vm865_vm10, %v859_v41, %v889_v3 }
 0x29c   : > { %v2867_v18 = vmul.f32 %v902_v47, %v2526_v25  ;;  %v741_v38 = vpop.f32.mrf.mxu2  ;;  %v901_v57 = vmul.f32 1.050701, %v895_v24 }
 0x29d   : > { %v2870_v21 = vmul.f32 %v903_v16, %v2528_v39  ;;  %v742_v58 = vadd.f32 %v741_v38, %v2856_v13 }
 0x29e   : > { %v2883_v4 = vmul.f32 %v901_v57, %v2513_v32 }
 0x29f   : > { %v848_v26 = vmul.f32 %v2859_v19, %v742_v58  ;;  %v1858_v49 = vpack.i.bf16 %v2870_v21, %v2867_v18 }
 0x2a0   : > { %v1888_v12 = vpack.i.bf16 %v2867_v18, %v2883_v4 }
 0x2a1   : > { %v858_v55 = vadd.f32 %v856_v46, %v848_v26  ;;  %1859 = vrot.lane.b32.xlu1 %v1858_v49, %s2125_s21  ;;  %1869 = vrot.lane.b32.xlu0 %v1858_v49, %s2126_s22 }
 0x2a2   : > { %1864 = vrot.lane.b32.xlu2 %v1858_v49, %s2127_s23 }
 0x2a3   : > { %v870_v6 = vmul.f32 1.442695, %v858_v55  ;;  %vm864_vm11 = vcmp.gt.f32.partialorder %v858_v55, 0.0 }
 0x2a5   : > { %2098 = vpow2.f32 %v870_v6 }
 0x2a6   : > { %v841_v9 = vpop.f32.mrf.mxu3 }
 0x2a7   : > { %v842_v2 = vadd.f32 %v841_v9, %v2856_v13 }
 0x2a9   : > { %v853_v34 = vmul.f32 %v2859_v19, %v842_v2  ;;  %1874 = vrot.lane.b32.xlu1 %v1858_v49, %s2128_s24 }
 0x2ab   : > { %v2099_v7 = vpop.eup %2098  ;;  %v863_v48 = vadd.f32 %v856_v46, %v853_v34 }
 0x2ac   : > { %v1599_v59 = vadd.f32 -1.0, %v2099_v7 }
 0x2ad   : > { %v880_v22 = vmul.f32 1.442695, %v863_v48  ;;  %vm869_vm12 = vcmp.gt.f32.partialorder %v863_v48, 0.0 }
 0x2ae   : > { %v888_v36 = vmul.f32 1.6732632, %v1599_v59  ;;  %v821_v51 = vpop.f32.mrf.mxu2 }
 0x2af   : > { %2100 = vpow2.f32 %v880_v22  ;;  %v822_v23 = vadd.f32 %v821_v51, %v2856_v13 }
 0x2b0   : > { %v894_v20 = vsel %vm864_vm11, %v858_v55, %v888_v36 }
 0x2b1   : > { %v900_v30 = vmul.f32 1.050701, %v894_v20  ;;  %v852_v60 = vmul.f32 %v2859_v19, %v822_v23  ;;  %1889 = vrot.lane.b32.xlu1 %v1888_v12, %s2130_s26 }
 0x2b3   : > { %v2891_v63 = vmul.f32 %v900_v30, %v2511_v61  ;;  %v862_v62 = vadd.f32 %v856_v46, %v852_v60 }
 0x2b5   : > { %v2101_v54 = vpop.eup %2100  ;;  %v878_v29 = vmul.f32 1.442695, %v862_v62  ;;  %v1883_v11 = vpack.i.bf16 %v2883_v4, %v2891_v63  ;;  %vm868_vm13 = vcmp.gt.f32.partialorder %v862_v62, 0.0 }
 0x2b6   : > { %v1604_v41 = vadd.f32 -1.0, %v2101_v54 }
 0x2b7   : > { %2102 = vpow2.f32 %v878_v29  ;;  %1884 = vrot.lane.b32.xlu0 %v1883_v11, %s2127_s23  ;;  %1879 = vrot.lane.b32.xlu2 %v1883_v11, %s2125_s21  ;;  %v2139_v29 = vmov 6  }
 0x2b8   : > { %v893_v13 = vmul.f32 1.6732632, %v1604_v41  ;;  %1978 = vset.pattern.permute.xlu1 %v2139_v29  ;;  %v2992_v41 = vld [vmem:[%s3511_s2] sm:$0xff] }
 0x2b9   : > { %1904 = vrot.lane.b32.xlu1 %v1883_v11, %s2128_s24 }
 0x2ba   : > { %v899_v19 = vsel %vm869_vm12, %v863_v48, %v893_v13 }
 0x2bb   : > { %v905_v17 = vmul.f32 1.050701, %v899_v19 }
 0x2bd   : > { %v2103_v10 = vpop.eup %2102  ;;  %v2902_v56 = vmul.f32 %v905_v17, %v2544_v28 }
 0x2be   : > { %v1603_v52 = vadd.f32 -1.0, %v2103_v10 }
 0x2bf   : > { %1899 = vrot.lane.b32.xlu0 %v1888_v12, %s2129_s25  ;;  %1894 = vrot.lane.b32.xlu2 %v1883_v11, %s2126_s22  ;;  %v1933_v43 = vpack.i.bf16 %v2902_v56, %v2891_v63 }
 0x2c0   : > { %v892_v46 = vmul.f32 1.6732632, %v1603_v52 }
 0x2c1   : > { %1914 = vrot.lane.b32.xlu1 %v1888_v12, %s2132_s28 }
 0x2c2   : > { %v898_v42 = vsel %vm868_vm13, %v862_v62, %v892_v46 }
 0x2c3   : > { %v904_v14 = vmul.f32 1.050701, %v898_v42 }
 0x2c5   : > { %v2905_v37 = vmul.f32 %v904_v14, %v2542_v27 }
 0x2c7   : > { %1909 = vrot.lane.b32.xlu2 %v1888_v12, %s2131_s27  ;;  %v1918_v33 = vpack.i.bf16 %v2902_v56, %v2905_v37  ;;  %v1958_v53 = vpack.i.bf16 %v2905_v37, %v2870_v21 }
 0x2c9   : > { %1934 = vrot.lane.b32.xlu1 %v1933_v43, %s2129_s25  ;;  %1919 = vrot.lane.b32.xlu0 %v1918_v33, %s2125_s21 }
 0x2cf   : > { %1924 = vrot.lane.b32.xlu2 %v1933_v43, %s2130_s26 }
 0x2d1   : > { %1954 = vrot.lane.b32.xlu1 %v1918_v33, %s2128_s24  ;;  %1929 = vrot.lane.b32.xlu0 %v1918_v33, %s2127_s23 }
 0x2d7   : > { %1939 = vrot.lane.b32.xlu2 %v1918_v33, %s2126_s22 }
 0x2d9   : > { %1959 = vrot.lane.b32.xlu1 %v1958_v53, %s2129_s25  ;;  %1944 = vrot.lane.b32.xlu0 %v1933_v43, %s2131_s27 }
 0x2df   : > { %1964 = vrot.lane.b32.xlu2 %v1933_v43, %s2132_s28 }
 0x2e1   : > { %1949 = vrot.lane.b32.xlu0 %v1958_v53, %s2130_s26  ;;  %1059 = vperm.xlu1 %1978, %v2992_v41  }
 0x2e7   : > { %1969 = vrot.lane.b32.xlu2 %v1958_v53, %s2131_s27 }
 0x2e9   : > { %1974 = vrot.lane.b32.xlu0 %v1958_v53, %s2132_s28 }
 0x2fc   : > { %v2926_v44 = vpop.permute.xlu2 %1864 }
 0x2fd   : > { %v1867_v38 = vunpack.i.h.bf16 %v2926_v44  ;;  %v1866_v58 = vunpack.i.l.bf16 %v2926_v44 }
 0x2ff   : > { %v1034_v57 = vsel %vm334_vm1, %v1866_v58, %v1867_v38 }
 0x311   : > { %v2928_v40 = vpop.permute.xlu2 %1879 }
 0x312   : > { %v1882_v8 = vunpack.i.h.bf16 %v2928_v40  ;;  %v1881_v47 = vunpack.i.l.bf16 %v2928_v40 }
 0x313   : > { %v2932_v16 = vpop.permute.xlu1 %1859  ;;  %v2934_v45 = vpop.permute.xlu0 %1869 }
 0x314   : > { %v1862_v26 = vunpack.i.h.bf16 %v2932_v16  ;;  %v1861_v49 = vunpack.i.l.bf16 %v2932_v16  ;;  %v1054_v3 = vsel %vm353_vm0, %v1881_v47, %v1882_v8  ;;  %v1872_v55 = vunpack.i.h.bf16 %v2934_v45 }
 0x315   : > { %v1871_v6 = vunpack.i.l.bf16 %v2934_v45  ;;  %1072 = vmatpush.msrb.mxu0 %v1054_v3 }
 0x316   : > { %v1053_v24 = vsel %vm353_vm0, %v1882_v8, %v1861_v49  ;;  %v1052_v9 = vsel %vm353_vm0, %v1861_v49, %v1862_v26 }
 0x317   : > { %1092 = vmatpush.msrb.mxu1 %v1053_v24  ;;  %1112 = vmatpush.msrb.mxu2 %v1052_v9  ;;  %v1016_v34 = vsel %vm315_vm2, %v1871_v6, %v1872_v55 }
 0x319   : > { %1113 = vmatpush.msrb.mxu2 %v1034_v57  ;;  %v2956_v2 = vpop.permute.xlu2 %1894 }
 0x31a   : > { %v1897_v60 = vunpack.i.h.bf16 %v2956_v2 }
 0x31b   : > { %v2962_v7 = vpop.permute.xlu1 %1874  ;;  %1114 = vmatpush.msrb.mxu2 %v1016_v34 }
 0x31c   : > { %v1877_v48 = vunpack.i.h.bf16 %v2962_v7  ;;  %v1876_v59 = vunpack.i.l.bf16 %v2962_v7  ;;  %v1017_v42 = vsel %vm315_vm2, %v1897_v60, %v1871_v6 }
 0x31e   : > { %v998_v22 = vsel %vm296_vm3, %v1876_v59, %v1877_v48 }
 0x31f   : > { %1115 = vmatpush.msrb.mxu2 %v998_v22 }
 0x321   : > { %1116 = vmatpush.msrb.mxu2 %v2867_v18  ;;  %v2971_v36 = vpop.permute.xlu2 %1909  ;;  %v1896_v18 = vunpack.i.l.bf16 %v2956_v2 }
 0x322   : > { %v1912_v3 = vunpack.i.h.bf16 %v2971_v36  ;;  %v1911_v6 = vunpack.i.l.bf16 %v2971_v36 }
 0x323   : > { %v2973_v51 = vpop.permute.xlu1 %1889  ;;  %v1018_v46 = vsel %vm315_vm2, %v1896_v18, %v1897_v60 }
 0x324   : > { %v1892_v23 = vunpack.i.h.bf16 %v2973_v51  ;;  %v1891_v12 = vunpack.i.l.bf16 %v2973_v51 }
 0x326   : > { %v981_v20 = vsel %vm277_vm4, %v1891_v12, %v1892_v23 }
 0x327   : > { %1117 = vmatpush.msrb.mxu2 %v981_v20 }
 0x329   : > { %v2981_v30 = vpop.permute.xlu0 %1884  ;;  %v3003_v17 = vpop.permute.xlu2 %1924 }
 0x32a   : > { %v1887_v62 = vunpack.i.h.bf16 %v2981_v30  ;;  %v1886_v54 = vunpack.i.l.bf16 %v2981_v30  ;;  %v1927_v14 = vunpack.i.h.bf16 %v3003_v17  ;;  %v1926_v43 = vunpack.i.l.bf16 %v3003_v17 }
 0x32b   : > { %v2987_v11 = vpop.permute.xlu1 %1904 }
 0x32c   : > { %v1907_v13 = vunpack.i.h.bf16 %v2987_v11  ;;  %v1906_v19 = vunpack.i.l.bf16 %v2987_v11  ;;  %v1036_v10 = vsel %vm334_vm1, %v1886_v54, %v1887_v62  ;;  %v1035_v52 = vsel %vm334_vm1, %v1887_v62, %v1866_v58 }
 0x32d   : > { %1073 = vmatpush.msrb.mxu0 %v1036_v10  ;;  %1093 = vmatpush.msrb.mxu1 %v1035_v52  ;;  %v983_v9 = vsel %vm277_vm4, %v1927_v14, %v1926_v43  ;;  %v982_v57 = vsel %vm277_vm4, %v1926_v43, %v1891_v12 }
 0x32e   : > { %v1000_v33 = vsel %vm296_vm3, %v1906_v19, %v1907_v13  ;;  %v999_v53 = vsel %vm296_vm3, %v1907_v13, %v1876_v59 }
 0x32f   : > { %1074 = vmatpush.msrb.mxu0 %v1018_v46  ;;  %1094 = vmatpush.msrb.mxu1 %v1017_v42 }
 0x331   : > { %v3019_v8 = vpop.permute.xlu0 %1899  ;;  %1075 = vmatpush.msrb.mxu0 %v1000_v33  ;;  %1095 = vmatpush.msrb.mxu1 %v999_v53  ;;  %v1940_v42 = vpop.permute.xlu2 %1939 }
 0x332   : > { %v1902_v58 = vunpack.i.h.bf16 %v3019_v8  ;;  %v1901_v49 = vunpack.i.l.bf16 %v3019_v8  ;;  %v1941_v53 = vunpack.i.l.bf16 %v1940_v42 }
 0x333   : > { %v3025_v24 = vpop.permute.xlu1 %1914  ;;  %1076 = vmatpush.msrb.mxu0 %v2891_v63  ;;  %1096 = vmatpush.msrb.mxu1 %v2883_v4  ;;  %v945_v4 = vsel %vm239_vm6, %v1911_v6, %v1912_v3  ;;  %v3048_v63 = vld [vmem:[%s3510_s1 + $0x10] sm:$0xff] }
 0x334   : > { %v963_v34 = vsel %vm258_vm5, %v1901_v49, %v1902_v58  ;;  %v1917_v59 = vunpack.i.h.bf16 %v3025_v24  ;;  %v1916_v22 = vunpack.i.l.bf16 %v3025_v24  ;;  %v1015_v16 = vsel %vm315_vm2, %v1872_v55, %v1941_v53 }
 0x335   : > { %1077 = vmatpush.msrb.mxu0 %v983_v9  ;;  %1097 = vmatpush.msrb.mxu1 %v982_v57 }
 0x336   : > { %1118 = vmatpush.msrb.mxu2 %v963_v34  ;;  %v927_v12 = vsel %vm220_vm7, %v1916_v22, %v1917_v59 }
 0x338   : > { %1119 = vmatpush.msrb.mxu2 %v945_v4 }
 0x33a   : > { %1120 = vmatpush.msrb.mxu2 %v927_v12 }
 0x33b   : > { %v3054_v20 = vpop.permute.xlu1 %1934  ;;  %v1920_v60 = vpop.permute.xlu0 %1919  ;;  %1608 = vmatmul.msk.f32.vlgmr.msrb.gmra.mxu2 %vm366_vm8, %v3048_v63 }
 0x33c   : > { %v1937_v62 = vunpack.i.h.bf16 %v3054_v20  ;;  %v1936_v29 = vunpack.i.l.bf16 %v3054_v20  ;;  %v1921_v13 = vunpack.i.l.bf16 %v1920_v60  ;;  %v1922_v55 = vunpack.i.h.bf16 %v1920_v60 }
 0x33d   : > { %v1942_v60 = vunpack.i.h.bf16 %v1940_v42 }
 0x33e   : > { %v965_v10 = vsel %vm258_vm5, %v1937_v62, %v1936_v29  ;;  %v964_v52 = vsel %vm258_vm5, %v1936_v29, %v1901_v49  ;;  %v1051_v46 = vsel %vm353_vm0, %v1862_v26, %v1921_v13  ;;  %v3078_v26 = vpop.permute.xlu2 %1964 }
 0x33f   : > { %1078 = vmatpush.msrb.mxu0 %v965_v10  ;;  %1098 = vmatpush.msrb.mxu1 %v964_v52  ;;  %v1967_v44 = vunpack.i.h.bf16 %v3078_v26  ;;  %v1014_v40 = vsel %vm315_vm2, %v1941_v53, %v1942_v60 }
 0x340   : > { %1132 = vmatpush.msrb.mxu3 %v1051_v46  ;;  %v1055_v46 = vsel %vm353_vm0, %v1922_v55, %v1881_v47  ;;  %v1019_v47 = vsel %vm315_vm2, %v1942_v60, %v1896_v18 }
 0x343   : > { %v1955_v43 = vpop.permute.xlu1 %1954  ;;  %v1930_v33 = vpop.permute.xlu0 %1929 }
 0x344   : > { %v1931_v9 = vunpack.i.l.bf16 %v1930_v33  ;;  %v1956_v57 = vunpack.i.l.bf16 %v1955_v43  ;;  %v1932_v29 = vunpack.i.h.bf16 %v1930_v33  ;;  %v1957_v42 = vunpack.i.h.bf16 %v1955_v43 }
 0x346   : > { %v1033_v34 = vsel %vm334_vm1, %v1867_v38, %v1931_v9  ;;  %v997_v49 = vsel %vm296_vm3, %v1877_v48, %v1956_v57  ;;  %v1966_v38 = vunpack.i.l.bf16 %v3078_v26  ;;  %v1970_v33 = vpop.permute.xlu2 %1969  ;;  %v1001_v2 = vsel %vm296_vm3, %v1957_v42, %v1906_v19 }
 0x347   : > { %1133 = vmatpush.msrb.mxu3 %v1033_v34  ;;  %v1971_v30 = vunpack.i.l.bf16 %v1970_v33  ;;  %v1972_v19 = vunpack.i.h.bf16 %v1970_v33 }
 0x348   : > { %v929_v10 = vsel %vm220_vm7, %v1967_v44, %v1966_v38 }
 0x349   : > { %1134 = vmatpush.msrb.mxu3 %v1015_v16  ;;  %v1032_v16 = vsel %vm334_vm1, %v1931_v9, %v1932_v29  ;;  %v996_v9 = vsel %vm296_vm3, %v1956_v57, %v1957_v42  ;;  %v944_v11 = vsel %vm239_vm6, %v1912_v3, %v1971_v30  ;;  %v943_v17 = vsel %vm239_vm6, %v1971_v30, %v1972_v19 }
 0x34b   : > { %v3084_v4 = vpop.permute.xlu0 %1944  ;;  %1135 = vmatpush.msrb.mxu3 %v997_v49  ;;  %v1960_v52 = vpop.permute.xlu1 %1959  ;;  %v1037_v49 = vsel %vm334_vm1, %v1932_v29, %v1886_v54 }
 0x34c   : > { %v1947_v45 = vunpack.i.h.bf16 %v3084_v4  ;;  %v1946_v12 = vunpack.i.l.bf16 %v3084_v4 }
 0x34d   : > { %1136 = vmatpush.msrb.mxu3 %v2870_v21  ;;  %v928_v21 = vsel %vm220_vm7, %v1966_v38, %v1916_v22 }
 0x34e   : > { %v947_v7 = vsel %vm239_vm6, %v1947_v45, %v1946_v12  ;;  %v946_v48 = vsel %vm239_vm6, %v1946_v12, %v1911_v6  ;;  %v1050_v6 = vsel %vm353_vm0, %v1921_v13, %v1922_v55  ;;  %v1961_v13 = vunpack.i.l.bf16 %v1960_v52 }
 0x34f   : > { %1079 = vmatpush.msrb.mxu0 %v947_v7  ;;  %1099 = vmatpush.msrb.mxu1 %v946_v48 }
 0x350   : > { %v962_v51 = vsel %vm258_vm5, %v1902_v58, %v1961_v13 }
 0x351   : > { %1080 = vmatpush.msrb.mxu0 %v929_v10  ;;  %1100 = vmatpush.msrb.mxu1 %v928_v21 }
 0x352   : > { %1606 = vmatmul.msk.f32.vlgmr.msrb.gmra.mxu0 %vm366_vm8, %v3048_v63  ;;  %1607 = vmatmul.msk.f32.vlgmr.msrb.gmra.mxu1 %vm366_vm8, %v3048_v63 }
 0x353   : > { %1152 = vmatpush.msra.mxu0 %v1050_v6  ;;  %1172 = vmatpush.msra.mxu1 %v1055_v46  ;;  %v1950_v22 = vpop.permute.xlu0 %1949  ;;  %v1060_v20 = vpop.permute.xlu1 %1059 }
 0x354   : > { %v1951_v34 = vunpack.i.l.bf16 %v1950_v22  ;;  %v1952_v54 = vunpack.i.h.bf16 %v1950_v22 }
 0x355   : > { %1153 = vmatpush.msra.mxu0 %v1032_v16  ;;  %1173 = vmatpush.msra.mxu1 %v1037_v49 }
 0x356   : > { %v980_v43 = vsel %vm277_vm4, %v1892_v23, %v1951_v34  ;;  %v1962_v23 = vunpack.i.h.bf16 %v1960_v52  ;;  %v979_v8 = vsel %vm277_vm4, %v1951_v34, %v1952_v54  ;;  %v978_v58 = vsel %vm277_vm4, %v1952_v54, %v1927_v14 }
 0x357   : > { %1154 = vmatpush.msra.mxu0 %v1014_v40  ;;  %1174 = vmatpush.msra.mxu1 %v1019_v47  ;;  %v942_v14 = vsel %vm239_vm6, %v1972_v19, %v1947_v45 }
 0x358   : > { %1137 = vmatpush.msrb.mxu3 %v980_v43  ;;  %v960_v36 = vsel %vm258_vm5, %v1962_v23, %v1937_v62 }
 0x359   : > { %1155 = vmatpush.msra.mxu0 %v996_v9  ;;  %1175 = vmatpush.msra.mxu1 %v1001_v2 }
 0x35a   : > { %1138 = vmatpush.msrb.mxu3 %v962_v51 }
 0x35b   : > { %1156 = vmatpush.msra.mxu0 %v2905_v37  ;;  %1176 = vmatpush.msra.mxu1 %v2902_v56  ;;  %v1975_v18 = vpop.permute.xlu0 %1974  ;;  %v961_v37 = vsel %vm258_vm5, %v1961_v13, %v1962_v23 }
 0x35c   : > { %v1976_v53 = vunpack.i.l.bf16 %v1975_v18  ;;  %1139 = vmatpush.msrb.mxu3 %v944_v11  ;;  %v1977_v56 = vunpack.i.h.bf16 %v1975_v18 }
 0x35d   : > { %1157 = vmatpush.msra.mxu0 %v979_v8  ;;  %1177 = vmatpush.msra.mxu1 %v978_v58 }
 0x35e   : > { %v926_v3 = vsel %vm220_vm7, %v1917_v59, %v1976_v53  ;;  %v925_v24 = vsel %vm220_vm7, %v1976_v53, %v1977_v56  ;;  %v924_v59 = vsel %vm220_vm7, %v1977_v56, %v1967_v44 }
 0x35f   : > { %1158 = vmatpush.msra.mxu0 %v961_v37  ;;  %1178 = vmatpush.msra.mxu1 %v960_v36 }
 0x360   : > { %1140 = vmatpush.msrb.mxu3 %v926_v3 }
 0x361   : > { %1609 = vmatmul.msk.f32.vlgmr.msrb.gmra.mxu3 %vm366_vm8, %v3048_v63  ;;  %1159 = vmatpush.msra.mxu0 %v943_v17 }
 0x362   : > { %1179 = vmatpush.msra.mxu1 %v942_v14 }
 0x363   : > { %1160 = vmatpush.msra.mxu0 %v925_v24 }
 0x364   : > { %1180 = vmatpush.msra.mxu1 %v924_v59  ;;  %1610 = vmatmul.msk.f32.vlgmr.msra.gmra.mxu0 %vm366_vm8, %v3048_v63 }
 0x365   : > { %1611 = vmatmul.msk.f32.vlgmr.msra.gmra.mxu1 %vm366_vm8, %v3048_v63 }
 0x3be   : > { %v1122_v62 = vpop.f32.mrf.mxu2 }
 0x3bf   : > { %v1123_v12 = vadd.f32 %v1122_v62, %v1060_v20 }
 0x3c1   : > { %v1187_v48 = vadd.f32 %v1123_v12, %v2499_v31 }
 0x3c3   : > { %v1201_v29 = vmul.f32 1.442695, %v1187_v48  ;;  %vm1193_vm9 = vcmp.gt.f32.partialorder %v1187_v48, 0.0 }
 0x3cf   : > { %v1082_v57 = vpop.f32.mrf.mxu0  ;;  %v1102_v4 = vpop.f32.mrf.mxu1 }
 0x3d0   : > { %v1083_v38 = vadd.f32 %v1082_v57, %v1060_v20  ;;  %v1103_v45 = vadd.f32 %v1102_v4, %v1060_v20 }
 0x3d2   : > { %v1185_v55 = vadd.f32 %v1083_v38, %v2493_v0  ;;  %v1186_v26 = vadd.f32 %v1103_v45, %v2496_v1 }
 0x3d4   : > { %v1197_v7 = vmul.f32 1.442695, %v1185_v55  ;;  %v1199_v44 = vmul.f32 1.442695, %v1186_v26  ;;  %vm1191_vm14 = vcmp.gt.f32.partialorder %v1185_v55, 0.0  ;;  %vm1192_vm15 = vcmp.gt.f32.partialorder %v1186_v26, 0.0 }
 0x3d6   : > { %2104 = vpow2.f32 %v1197_v7 }
 0x3d7   : > { %2106 = vpow2.f32 %v1199_v44 }
 0x3d8   : > { %2108 = vpow2.f32 %v1201_v29 }
 0x3dc   : > { %v2105_v10 = vpop.eup %2104 }
 0x3dd   : > { %v2107_v63 = vpop.eup %2106  ;;  %v1612_v21 = vadd.f32 -1.0, %v2105_v10 }
 0x3de   : > { %v1613_v60 = vadd.f32 -1.0, %v2107_v63  ;;  %v2109_v16 = vpop.eup %2108 }
 0x3df   : > { %v1215_v52 = vmul.f32 1.6732632, %v1612_v21  ;;  %v1614_v9 = vadd.f32 -1.0, %v2109_v16 }
 0x3e0   : > { %v1216_v6 = vmul.f32 1.6732632, %v1613_v60 }
 0x3e1   : > { %v1221_v46 = vsel %vm1191_vm14, %v1185_v55, %v1215_v52  ;;  %v1162_v0 = vpop.f32.mrf.mxu0 }
 0x3e2   : > { %v1227_v22 = vmul.f32 1.050701, %v1221_v46  ;;  %v1222_v1 = vsel %vm1192_vm15, %v1186_v26, %v1216_v6  ;;  %v1163_v33 = vadd.f32 %v1162_v0, %v1060_v20  ;;  %v1182_v42 = vpop.f32.mrf.mxu1 }
 0x3e3   : > { %v1228_v34 = vmul.f32 1.050701, %v1222_v1  ;;  %v1183_v31 = vadd.f32 %v1182_v42, %v1060_v20 }
 0x3e4   : > { %v3183_v49 = vmul.f32 %v1227_v22, %v2511_v61  ;;  %v1189_v13 = vadd.f32 %v1163_v33, %v2508_v50  ;;  %v1142_v40 = vpop.f32.mrf.mxu3  ;;  %v1217_v50 = vmul.f32 1.6732632, %v1614_v9 }
 0x3e5   : > { %v3187_v47 = vmul.f32 %v1228_v34, %v2513_v32  ;;  %v1190_v43 = vadd.f32 %v1183_v31, %v2515_v5  ;;  %v1143_v30 = vadd.f32 %v1142_v40, %v1060_v20 }
 0x3e6   : > { %v1205_v54 = vmul.f32 1.442695, %v1189_v13  ;;  %v1223_v18 = vsel %vm1193_vm9, %v1187_v48, %v1217_v50  ;;  %vm1195_vm10 = vcmp.gt.f32.partialorder %v1189_v13, 0.0 }
 0x3e7   : > { %v1207_v2 = vmul.f32 1.442695, %v1190_v43  ;;  %v1188_v51 = vadd.f32 %v1143_v30, %v2501_v35  ;;  %v1989_v23 = vpack.i.bf16 %v3187_v47, %v3183_v49  ;;  %v1229_v8 = vmul.f32 1.050701, %v1223_v18 }
 0x3e8   : > { %2110 = vpow2.f32 %v1205_v54  ;;  %vm1196_vm12 = vcmp.gt.f32.partialorder %v1190_v43, 0.0 }
 0x3e9   : > { %2112 = vpow2.f32 %v1207_v2  ;;  %v1203_v61 = vmul.f32 1.442695, %v1188_v51  ;;  %1990 = vrot.lane.b32.xlu0 %v1989_v23, %s2126_s22  ;;  %1985 = vrot.lane.b32.xlu1 %v1989_v23, %s2127_s23  ;;  %vm1194_vm11 = vcmp.gt.f32.partialorder %v1188_v51, 0.0  ;;  %v3198_v17 = vmul.f32 %v1229_v8, %v2526_v25 }
 0x3ea   : > { %1980 = vrot.lane.b32.xlu2 %v1989_v23, %s2125_s21 }
 0x3eb   : > { %2114 = vpow2.f32 %v1203_v61 }
 0x3ee   : > { %v2111_v32 = vpop.eup %2110 }
 0x3ef   : > { %v2113_v5 = vpop.eup %2112  ;;  %v1616_v11 = vadd.f32 -1.0, %v2111_v32 }
 0x3f0   : > { %v1617_v35 = vadd.f32 -1.0, %v2113_v5 }
 0x3f1   : > { %v2115_v19 = vpop.eup %2114  ;;  %v1219_v53 = vmul.f32 1.6732632, %v1616_v11 }
 0x3f2   : > { %v1615_v58 = vadd.f32 -1.0, %v2115_v19  ;;  %1995 = vrot.lane.b32.xlu2 %v1989_v23, %s2128_s24  ;;  %v1220_v36 = vmul.f32 1.6732632, %v1617_v35 }
 0x3f3   : > { %v1225_v56 = vsel %vm1195_vm10, %v1189_v13, %v1219_v53 }
 0x3f4   : > { %v1231_v37 = vmul.f32 1.050701, %v1225_v56  ;;  %v1218_v3 = vmul.f32 1.6732632, %v1615_v58  ;;  %v1226_v59 = vsel %vm1196_vm12, %v1190_v43, %v1220_v36 }
 0x3f5   : > { %v1232_v57 = vmul.f32 1.050701, %v1226_v59 }
 0x3f6   : > { %v3201_v14 = vmul.f32 %v1231_v37, %v2542_v27  ;;  %v1224_v24 = vsel %vm1194_vm11, %v1188_v51, %v1218_v3 }
 0x3f7   : > { %v1230_v62 = vmul.f32 1.050701, %v1224_v24  ;;  %v3212_v27 = vmul.f32 %v1232_v57, %v2544_v28 }
 0x3f8   : > { %v2014_v20 = vpack.i.bf16 %v3201_v14, %v3198_v17 }
 0x3f9   : > { %v3209_v25 = vmul.f32 %v1230_v62, %v2528_v39 }
 0x3fa   : > { %2000 = vrot.lane.b32.xlu2 %v1989_v23, %s2130_s26  ;;  %2015 = vrot.lane.b32.xlu0 %v2014_v20, %s2125_s21 }
 0x3fb   : > { %2030 = vrot.lane.b32.xlu1 %v2014_v20, %s2126_s22  ;;  %v2039_v4 = vpack.i.bf16 %v3209_v25, %v3212_v27 }
 0x402   : > { %2005 = vrot.lane.b32.xlu2 %v1989_v23, %s2129_s25  ;;  %2035 = vrot.lane.b32.xlu0 %v2014_v20, %s2128_s24 }
 0x403   : > { %2040 = vrot.lane.b32.xlu1 %v2039_v4, %s2125_s21 }
 0x40a   : > { %2010 = vrot.lane.b32.xlu2 %v1989_v23, %s2131_s27  ;;  %2045 = vrot.lane.b32.xlu0 %v2039_v4, %s2130_s26 }
 0x40b   : > { %2050 = vrot.lane.b32.xlu1 %v2039_v4, %s2127_s23 }
 0x412   : > { %2020 = vrot.lane.b32.xlu2 %v2014_v20, %s2127_s23  ;;  %2055 = vrot.lane.b32.xlu0 %v2039_v4, %s2129_s25 }
 0x413   : > { %2060 = vrot.lane.b32.xlu1 %v2039_v4, %s2126_s22  ;;  %s197_s22 = scalar_lea.vmem %s3513_s4, %s1627_s17 }
 0x41a   : > { %2025 = vrot.lane.b32.xlu2 %v1989_v23, %s2132_s28  ;;  %2065 = vrot.lane.b32.xlu0 %v2039_v4, %s2131_s27 }
 0x41b   : > { %2070 = vrot.lane.b32.xlu1 %v2039_v4, %s2128_s24 }
 0x422   : > { %1283 = vrot.lane.b32.xlu2 %v3201_v14, %s2129_s25  ;;  %2075 = vrot.lane.b32.xlu0 %v2039_v4, %s2132_s28 }
 0x423   : > { %1301 = vrot.lane.b32.xlu1 %v3201_v14, %s2130_s26 }
 0x42a   : > { %1297 = vrot.lane.b32.xlu2 %v3198_v17, %s2130_s26  ;;  %1265 = vrot.lane.b32.xlu0 %v3201_v14, %s2131_s27 }
 0x42b   : > { %1247 = vrot.lane.b32.xlu1 %v3201_v14, %s2132_s28 }
 0x432   : > { %1243 = vrot.lane.b32.xlu2 %v3198_v17, %s2132_s28  ;;  %1279 = vrot.lane.b32.xlu0 %v3198_v17, %s2129_s25 }
 0x433   : > { %1261 = vrot.lane.b32.xlu1 %v3198_v17, %s2131_s27 }
 0x444   : > { %v3245_v39 = vpop.permute.xlu2 %1980 }
 0x445   : > { %v1983_v28 = vunpack.i.h.bf16 %v3245_v39  ;;  %v1982_v38 = vunpack.i.l.bf16 %v3245_v39 }
 0x447   : > { %v1381_v45 = vsel %vm353_vm0, %v1982_v38, %v1983_v28 }
 0x448   : > { %1399 = vmatpush.msra.mxu2 %v1381_v45  ;;  %v3369_v45 = vld [vmem:[%s3510_s1 + $0x18] sm:$0xff] }
 0x44c   : > { %v3253_v12 = vpop.permute.xlu2 %1995 }
 0x44d   : > { %v1998_v21 = vunpack.i.h.bf16 %v3253_v12  ;;  %v1997_v60 = vunpack.i.l.bf16 %v3253_v12 }
 0x44f   : > { %v1327_v46 = vsel %vm296_vm3, %v1997_v60, %v1998_v21 }
 0x454   : > { %v3255_v55 = vpop.permute.xlu2 %2000 }
 0x455   : > { %v2003_v2 = vunpack.i.h.bf16 %v3255_v55  ;;  %v2002_v51 = vunpack.i.l.bf16 %v3255_v55 }
 0x457   : > { %v1309_v19 = vsel %vm277_vm4, %v2002_v51, %v2003_v2 }
 0x45b   : > { %v3257_v26 = vpop.permute.xlu0 %1990  ;;  %v3259_v7 = vpop.permute.xlu1 %1985 }
 0x45c   : > { %v3261_v44 = vpop.permute.xlu2 %2005  ;;  %v1993_v48 = vunpack.i.h.bf16 %v3257_v26  ;;  %v1992_v29 = vunpack.i.l.bf16 %v3257_v26  ;;  %v1988_v10 = vunpack.i.h.bf16 %v3259_v7  ;;  %v1987_v63 = vunpack.i.l.bf16 %v3259_v7 }
 0x45d   : > { %v2008_v32 = vunpack.i.h.bf16 %v3261_v44  ;;  %v2007_v5 = vunpack.i.l.bf16 %v3261_v44 }
 0x45e   : > { %v1363_v52 = vsel %vm334_vm1, %v1987_v63, %v1988_v10  ;;  %v1345_v6 = vsel %vm315_vm2, %v1992_v29, %v1993_v48 }
 0x45f   : > { %1400 = vmatpush.msra.mxu2 %v1363_v52 }
 0x461   : > { %1401 = vmatpush.msra.mxu2 %v1345_v6 }
 0x463   : > { %1402 = vmatpush.msra.mxu2 %v1327_v46 }
 0x464   : > { %v3281_v0 = vpop.permute.xlu2 %2010 }
 0x465   : > { %1403 = vmatpush.msra.mxu2 %v3183_v49  ;;  %v2013_v11 = vunpack.i.h.bf16 %v3281_v0  ;;  %v2012_v35 = vunpack.i.l.bf16 %v3281_v0 }
 0x467   : > { %v1273_v20 = vsel %vm239_vm6, %v2012_v35, %v2013_v11 }
 0x46c   : > { %v3284_v22 = vpop.permute.xlu2 %2020  ;;  %v3286_v1 = vpop.permute.xlu0 %2015 }
 0x46d   : > { %v2022_v33 = vunpack.i.l.bf16 %v3284_v22  ;;  %v2017_v42 = vunpack.i.l.bf16 %v3286_v1  ;;  %v3290_v34 = vpop.permute.xlu1 %2030  ;;  %v2018_v54 = vunpack.i.h.bf16 %v3286_v1  ;;  %v2023_v36 = vunpack.i.h.bf16 %v3284_v22 }
 0x46e   : > { %v2032_v31 = vunpack.i.l.bf16 %v3290_v34  ;;  %v2033_v6 = vunpack.i.h.bf16 %v3290_v34  ;;  %v2140_v34 = vmov 7  }
 0x46f   : > { %v1380_v16 = vsel %vm353_vm0, %v1983_v28, %v2017_v42  ;;  %v1362_v13 = vsel %vm334_vm1, %v1988_v10, %v2022_v33  ;;  %2079 = vset.pattern.permute.xlu0 %v2140_v34 }
 0x470   : > { %1419 = vmatpush.msra.mxu3 %v1380_v16  ;;  %v1344_v49 = vsel %vm315_vm2, %v1993_v48, %v2032_v31  ;;  %1386 = vperm.xlu0 %2079, %v2992_v41  }
 0x472   : > { %1420 = vmatpush.msra.mxu3 %v1362_v13 }
 0x474   : > { %v3301_v40 = vpop.permute.xlu0 %2035  ;;  %1421 = vmatpush.msra.mxu3 %v1344_v49  ;;  %v3322_v18 = vpop.permute.xlu2 %2025 }
 0x475   : > { %v2037_v43 = vunpack.i.l.bf16 %v3301_v40  ;;  %v3304_v30 = vpop.permute.xlu1 %2040  ;;  %v2028_v8 = vunpack.i.h.bf16 %v3322_v18  ;;  %v2027_v58 = vunpack.i.l.bf16 %v3322_v18 }
 0x476   : > { %v2043_v9 = vunpack.i.h.bf16 %v3304_v30  ;;  %v2042_v3 = vunpack.i.l.bf16 %v3304_v30 }
 0x477   : > { %v1326_v23 = vsel %vm296_vm3, %v1998_v21, %v2037_v43  ;;  %v1255_v28 = vsel %vm220_vm7, %v2027_v58, %v2028_v8 }
 0x478   : > { %1422 = vmatpush.msra.mxu3 %v1326_v23  ;;  %v1379_v61 = vsel %vm353_vm0, %v2017_v42, %v2043_v9  ;;  %v1378_v50 = vsel %vm353_vm0, %v2043_v9, %v2018_v54  ;;  %v1382_v48 = vsel %vm353_vm0, %v2042_v3, %v1982_v38  ;;  %v1377_v55 = vsel %vm353_vm0, %v2018_v54, %v2042_v3 }
 0x479   : > { %1439 = vmatpush.msrb.mxu0 %v1379_v61  ;;  %1459 = vmatpush.msrb.mxu1 %v1378_v50 }
 0x47a   : > { %1423 = vmatpush.msra.mxu3 %v3187_v47  ;;  %v1291_v47 = vsel %vm258_vm5, %v2007_v5, %v2008_v32 }
 0x47c   : > { %v3331_v53 = vpop.permute.xlu0 %2045  ;;  %1424 = vmatpush.msra.mxu3 %v1309_v19 }
 0x47d   : > { %v2047_v56 = vunpack.i.l.bf16 %v3331_v53  ;;  %v3336_v37 = vpop.permute.xlu1 %2050  ;;  %v2048_v41 = vunpack.i.h.bf16 %v3331_v53 }
 0x47e   : > { %v2053_v24 = vunpack.i.h.bf16 %v3336_v37  ;;  %1425 = vmatpush.msra.mxu3 %v1291_v47  ;;  %v2052_v62 = vunpack.i.l.bf16 %v3336_v37 }
 0x47f   : > { %v1310_v59 = vsel %vm277_vm4, %v2047_v56, %v2002_v51 }
 0x480   : > { %1404 = vmatpush.msra.mxu2 %v1310_v59  ;;  %1426 = vmatpush.msra.mxu3 %v1273_v20  ;;  %v1361_v57 = vsel %vm334_vm1, %v2022_v33, %v2053_v24  ;;  %v1360_v4 = vsel %vm334_vm1, %v2053_v24, %v2023_v36  ;;  %v1364_v21 = vsel %vm334_vm1, %v2052_v62, %v1987_v63  ;;  %v3389_v33 = vpop.permute.xlu2 %1283 }
 0x481   : > { %1440 = vmatpush.msrb.mxu0 %v1361_v57  ;;  %1460 = vmatpush.msrb.mxu1 %v1360_v4 }
 0x482   : > { %1427 = vmatpush.msra.mxu3 %v1255_v28 }
 0x483   : > { %1620 = vmatmul.msk.f32.vlgmr.msra.gmra.mxu3 %vm366_vm8, %v3369_v45 }
 0x484   : > { %1499 = vmatpush.msrb.mxu3 %v1382_v48  ;;  %v3377_v10 = vpop.permute.xlu0 %2055 }
 0x485   : > { %v2057_v39 = vunpack.i.l.bf16 %v3377_v10  ;;  %v2061_v52 = vpop.permute.xlu1 %2060 }
 0x486   : > { %1500 = vmatpush.msrb.mxu3 %v1364_v21  ;;  %v2063_v38 = vunpack.i.h.bf16 %v2061_v52  ;;  %v2062_v46 = vunpack.i.l.bf16 %v2061_v52 }
 0x487   : > { %v1292_v7 = vsel %vm258_vm5, %v2057_v39, %v2007_v5 }
 0x488   : > { %1405 = vmatpush.msra.mxu2 %v1292_v7  ;;  %v1343_v63 = vsel %vm315_vm2, %v2032_v31, %v2063_v38  ;;  %v1342_v42 = vsel %vm315_vm2, %v2063_v38, %v2033_v6  ;;  %v1346_v16 = vsel %vm315_vm2, %v2062_v46, %v1992_v29  ;;  %v2038_v31 = vunpack.i.h.bf16 %v3301_v40  ;;  %v1298_v5 = vpop.permute.xlu2 %1297 }
 0x489   : > { %1441 = vmatpush.msrb.mxu0 %v1343_v63  ;;  %1461 = vmatpush.msrb.mxu1 %v1342_v42  ;;  %v1308_v12 = vsel %vm277_vm4, %v2003_v2, %v1298_v5  ;;  %v1359_v2 = vsel %vm334_vm1, %v2023_v36, %v2052_v62  ;;  %v1341_v1 = vsel %vm315_vm2, %v2033_v6, %v2062_v46 }
 0x48a   : > { %1501 = vmatpush.msrb.mxu3 %v1346_v16 }
 0x48c   : > { %v3403_v13 = vpop.permute.xlu0 %2065 }
 0x48d   : > { %v2067_v49 = vunpack.i.l.bf16 %v3403_v13  ;;  %v2071_v9 = vpop.permute.xlu1 %2070  ;;  %v2068_v37 = vunpack.i.h.bf16 %v3403_v13 }
 0x48e   : > { %v2073_v51 = vunpack.i.h.bf16 %v2071_v9  ;;  %v2072_v23 = vunpack.i.l.bf16 %v2071_v9 }
 0x48f   : > { %v1274_v26 = vsel %vm239_vm6, %v2067_v49, %v2012_v35 }
 0x490   : > { %1406 = vmatpush.msra.mxu2 %v1274_v26  ;;  %v1325_v29 = vsel %vm296_vm3, %v2037_v43, %v2073_v51  ;;  %v1324_v61 = vsel %vm296_vm3, %v2073_v51, %v2038_v31  ;;  %v1328_v50 = vsel %vm296_vm3, %v2072_v23, %v1997_v60  ;;  %v1307_v60 = vsel %vm277_vm4, %v1298_v5, %v2048_v41  ;;  %v1244_v20 = vpop.permute.xlu2 %1243 }
 0x491   : > { %1442 = vmatpush.msrb.mxu0 %v1325_v29  ;;  %1462 = vmatpush.msrb.mxu1 %v1324_v61  ;;  %v1323_v22 = vsel %vm296_vm3, %v2038_v31, %v2072_v23  ;;  %v1254_v4 = vsel %vm220_vm7, %v2028_v8, %v1244_v20 }
 0x492   : > { %1502 = vmatpush.msrb.mxu3 %v1328_v50 }
 0x493   : > { %1443 = vmatpush.msrb.mxu0 %v3198_v17  ;;  %1463 = vmatpush.msrb.mxu1 %v3209_v25 }
 0x494   : > { %1503 = vmatpush.msrb.mxu3 %v3212_v27  ;;  %v2076_v40 = vpop.permute.xlu0 %2075  ;;  %v1287_v27 = vsel %vm258_vm5, %v3389_v33, %v2057_v39 }
 0x495   : > { %v2077_v43 = vunpack.i.l.bf16 %v2076_v40  ;;  %v1302_v35 = vpop.permute.xlu1 %1301  ;;  %1444 = vmatpush.msrb.mxu0 %v1308_v12  ;;  %1464 = vmatpush.msrb.mxu1 %v1307_v60  ;;  %v2078_v3 = vunpack.i.h.bf16 %v2076_v40 }
 0x496   : > { %v1305_v17 = vsel %vm277_vm4, %v1302_v35, %v2047_v56  ;;  %v1306_v56 = vsel %vm277_vm4, %v2048_v41, %v1302_v35 }
 0x497   : > { %1504 = vmatpush.msrb.mxu3 %v1305_v17  ;;  %v1256_v25 = vsel %vm220_vm7, %v2077_v43, %v2027_v58  ;;  %v2058_v58 = vunpack.i.h.bf16 %v3377_v10  ;;  %v1253_v0 = vsel %vm220_vm7, %v1244_v20, %v2078_v3 }
 0x498   : > { %1407 = vmatpush.msra.mxu2 %v1256_v25 }
 0x499   : > { %1505 = vmatpush.msrb.mxu3 %v1287_v27  ;;  %1619 = vmatmul.msk.f32.vlgmr.msra.gmra.mxu2 %vm366_vm8, %v3369_v45  ;;  %v1288_v36 = vsel %vm258_vm5, %v2058_v58, %v3389_v33 }
 0x49a   : > { %1479 = vmatpush.msrb.mxu2 %v1377_v55 }
 0x49c   : > { %1480 = vmatpush.msrb.mxu2 %v1359_v2  ;;  %v1266_v19 = vpop.permute.xlu0 %1265 }
 0x49d   : > { %v1248_v30 = vpop.permute.xlu1 %1247  ;;  %v1269_v54 = vsel %vm239_vm6, %v1266_v19, %v2067_v49  ;;  %v1270_v62 = vsel %vm239_vm6, %v2068_v37, %v1266_v19 }
 0x49e   : > { %1481 = vmatpush.msrb.mxu2 %v1341_v1  ;;  %1506 = vmatpush.msrb.mxu3 %v1269_v54  ;;  %v1251_v53 = vsel %vm220_vm7, %v1248_v30, %v2077_v43 }
 0x4a0   : > { %1482 = vmatpush.msrb.mxu2 %v1323_v22  ;;  %1507 = vmatpush.msrb.mxu3 %v1251_v53 }
 0x4a1   : > { %1624 = vmatmul.msk.f32.vlgmr.msrb.gmra.mxu3 %vm366_vm8, %v3369_v45 }
 0x4a2   : > { %1483 = vmatpush.msrb.mxu2 %v3201_v14 }
 0x4a4   : > { %1484 = vmatpush.msrb.mxu2 %v1306_v56  ;;  %v1280_v47 = vpop.permute.xlu0 %1279 }
 0x4a5   : > { %v1262_v24 = vpop.permute.xlu1 %1261  ;;  %v1290_v14 = vsel %vm258_vm5, %v2008_v32, %v1280_v47  ;;  %v1289_v59 = vsel %vm258_vm5, %v1280_v47, %v2058_v58  ;;  %v1252_v32 = vsel %vm220_vm7, %v2078_v3, %v1248_v30 }
 0x4a6   : > { %1485 = vmatpush.msrb.mxu2 %v1288_v36  ;;  %1445 = vmatpush.msrb.mxu0 %v1290_v14  ;;  %v1272_v57 = vsel %vm239_vm6, %v2013_v11, %v1262_v24  ;;  %v1271_v44 = vsel %vm239_vm6, %v1262_v24, %v2068_v37 }
 0x4a7   : > { %1465 = vmatpush.msrb.mxu1 %v1289_v59 }
 0x4a8   : > { %1486 = vmatpush.msrb.mxu2 %v1270_v62  ;;  %1446 = vmatpush.msrb.mxu0 %v1272_v57 }
 0x4a9   : > { %1466 = vmatpush.msrb.mxu1 %v1271_v44 }
 0x4aa   : > { %1487 = vmatpush.msrb.mxu2 %v1252_v32  ;;  %1447 = vmatpush.msrb.mxu0 %v1254_v4 }
 0x4ab   : > { %1467 = vmatpush.msrb.mxu1 %v1253_v0  ;;  %1623 = vmatmul.msk.f32.vlgmr.msrb.gmra.mxu2 %vm366_vm8, %v3369_v45 }
 0x4ac   : > { %1621 = vmatmul.msk.f32.vlgmr.msrb.gmra.mxu0 %vm366_vm8, %v3369_v45  ;;  %1622 = vmatmul.msk.f32.vlgmr.msrb.gmra.mxu1 %vm366_vm8, %v3369_v45 }
 0x4e2   : > { %v1387_v11 = vpop.permute.xlu0 %1386 }
 0x506   : > { %v1429_v18 = vpop.f32.mrf.mxu3 }
 0x507   : > { %v1430_v15 = vadd.f32 %v1429_v18, %v1387_v11 }
 0x509   : > { %1513 = vst [vmem:[%s197_s22 + $0x8] sm:$0xff] %v1430_v15 }
 0x51c   : > { %v1409_v8 = vpop.f32.mrf.mxu2 }
 0x51d   : > { %v1410_v28 = vadd.f32 %v1409_v8, %v1387_v11 }
 0x51f   : > { %1512 = vst [vmem:[%s197_s22] sm:$0xff] %v1410_v28 }
 0x524   : > { %v1509_v48 = vpop.f32.mrf.mxu3 }
 0x525   : > { %v1510_v10 = vadd.f32 %v1509_v48, %v1387_v11 }
 0x527   : > { %1517 = vst [vmem:[%s197_s22 + $0x28] sm:$0xff] %v1510_v10 }
 0x529   : > { %v1449_v21 = vpop.f32.mrf.mxu0  ;;  %v1469_v52 = vpop.f32.mrf.mxu1 }
 0x52a   : > { %v1450_v39 = vadd.f32 %v1449_v21, %v1387_v11  ;;  %v1470_v6 = vadd.f32 %v1469_v52, %v1387_v11 }
 0x52c   : > { %1514 = vst [vmem:[%s197_s22 + $0x10] sm:$0xff] %v1450_v39 }
 0x52d   : > { %1515 = vst [vmem:[%s197_s22 + $0x18] sm:$0xff] %v1470_v6 }
 0x52e   : > { %v1489_v45 = vpop.f32.mrf.mxu2 }
 0x52f   : > { %v1490_v38 = vadd.f32 %v1489_v45, %v1387_v11 }
 0x531   : > { %1516 = vst [vmem:[%s197_s22 + $0x20] sm:$0xff] %v1490_v38 }
 0x532 PF: > { %s14_s15 = sadd.s32 1, %s2123_s15  }
 0x533   : > { %p11_p4 = scmp.ge.s32.totalorder %s14_s15, 4  }
 0x535   :  { %13 = sbr.rel (!%p11_p4) target bundleno = 1 (0x1), region = 69 }

</bundles_post_ra>
